<compile_context>
chip_gen: v5e
topology: v5e:2x2
jax: 0.10.0
libtpu: 0.0.40
codegen_flags: <defaults>
</compile_context>

<pallas_src>
import functools

import jax
import jax.numpy as jnp
import numpy as np
from jax.experimental import pallas as pl
from jax.experimental.pallas import tpu as pltpu


def clip_layer_kernel(x_ref,
                      ln1_g_ref, ln1_b_ref,
                      wq_ref, wk_ref, wv_ref,
                      bq_ref, bk_ref, bv_ref,
                      wo_ref, bo_ref,
                      ln2_g_ref, ln2_b_ref,
                      w1_ref, b1_ref,
                      w2_ref, b2_ref,
                      o_ref,
                      *, n_heads, d_head):
    x = x_ref[0]                       # (S, D) — one batch element per grid step
    S, D = x.shape
    eps = 1e-5
    NEG = jnp.float32(-1e30)           # finite "minus infinity" for the causal mask

    def layernorm(v, g, b):            # f32 elementwise math
        mu = jnp.mean(v, axis=-1, keepdims=True)
        var = jnp.mean((v - mu) ** 2, axis=-1, keepdims=True)
        return (v - mu) * jax.lax.rsqrt(var + eps) * g + b

    # ---- block 1: LN1 + causal self-attention + residual ----
    residue = x
    xn = layernorm(x, ln1_g_ref[...], ln1_b_ref[...])
    xb = xn.astype(jnp.bfloat16)       # bf16 operands, f32 accumulation

    scale = d_head ** -0.5
    # q/k/v produced directly from pre-split weights; fold 1/sqrt(d_head) into q.
    q = (jnp.dot(xb, wq_ref[...], preferred_element_type=jnp.float32) + bq_ref[...]) * scale
    k = jnp.dot(xb, wk_ref[...], preferred_element_type=jnp.float32) + bk_ref[...]
    v = jnp.dot(xb, wv_ref[...], preferred_element_type=jnp.float32) + bv_ref[...]

    def to_heads(t):                   # (S, D) -> (H, S, d_head), bf16
        return jnp.transpose(t.astype(jnp.bfloat16).reshape(S, n_heads, d_head),
                             (1, 0, 2))

    qh = to_heads(q)
    kh = to_heads(k)
    vh = to_heads(v)

    # Batched over heads: one big MXU op instead of n_heads tiny ones.
    s = jnp.einsum('hqd,hkd->hqk', qh, kh,
                   preferred_element_type=jnp.float32)        # (H, S, S) f32

    row = jax.lax.broadcasted_iota(jnp.int32, (S, S), 0)
    col = jax.lax.broadcasted_iota(jnp.int32, (S, S), 1)
    causal = (col > row)[None, :, :]                          # strictly above diagonal masked
    s = jnp.where(causal, NEG, s)

    m = jnp.max(s, axis=-1, keepdims=True)
    p = jnp.exp(s - m)
    l = jnp.sum(p, axis=-1, keepdims=True)
    p = p * pl.reciprocal(l, approx=True)                     # divide on the EUP slot

    o = jnp.einsum('hqk,hkd->hqd', p.astype(jnp.bfloat16), vh,
                   preferred_element_type=jnp.float32)        # (H, S, d_head) f32
    attn = jnp.transpose(o, (1, 0, 2)).reshape(S, D)
    attn = jnp.dot(attn.astype(jnp.bfloat16), wo_ref[...],
                   preferred_element_type=jnp.float32) + bo_ref[...]

    x1 = attn + residue

    # ---- block 2: LN2 + MLP (quick GELU) + residual ----
    residue2 = x1
    xn2 = layernorm(x1, ln2_g_ref[...], ln2_b_ref[...]).astype(jnp.bfloat16)
    hid = jnp.dot(xn2, w1_ref[...], preferred_element_type=jnp.float32) + b1_ref[...]
    hid = hid * jax.nn.sigmoid(1.702 * hid)                   # quickGELU, f32
    out = jnp.dot(hid.astype(jnp.bfloat16), w2_ref[...],
                  preferred_element_type=jnp.float32) + b2_ref[...]
    o_ref[0] = out + residue2


def clip_layer(x, params, n_heads):
    (ln1_g, ln1_b, w_in, b_in, w_out, b_out,
     ln2_g, ln2_b, w1, b1, w2, b2) = params
    B, S, D = x.shape
    d_head = D // n_heads

    # Pre-split the fused QKV projection (q/k/v produced directly in the kernel, no
    # lane-crossing slices of an (S, 3D) buffer) and cast weight matrices to bf16.
    w_q, w_k, w_v = [w.astype(jnp.bfloat16) for w in jnp.split(w_in, 3, axis=1)]
    b_q, b_k, b_v = jnp.split(b_in, 3, axis=1)
    w_out_b = w_out.astype(jnp.bfloat16)
    w1_b = w1.astype(jnp.bfloat16)
    w2_b = w2.astype(jnp.bfloat16)

    def full2d(shape):
        return pl.BlockSpec(shape, lambda b: (0, 0))

    kernel = functools.partial(clip_layer_kernel, n_heads=n_heads, d_head=d_head)
    return pl.pallas_call(
        kernel,
        out_shape=jax.ShapeDtypeStruct((B, S, D), jnp.float32),
        grid=(B,),
        in_specs=[
            pl.BlockSpec((1, S, D), lambda b: (b, 0, 0)),    # x
            full2d((1, D)), full2d((1, D)),                  # layernorm_1 gamma/beta
            full2d((D, D)), full2d((D, D)), full2d((D, D)),  # q/k/v projection W (bf16)
            full2d((1, D)), full2d((1, D)), full2d((1, D)),  # q/k/v projection b (f32)
            full2d((D, D)), full2d((1, D)),                  # out_proj W (bf16) / b
            full2d((1, D)), full2d((1, D)),                  # layernorm_2 gamma/beta
            full2d((D, 4 * D)), full2d((1, 4 * D)),          # linear_1 W (bf16) / b
            full2d((4 * D, D)), full2d((1, D)),              # linear_2 W (bf16) / b
        ],
        out_specs=pl.BlockSpec((1, S, D), lambda b: (b, 0, 0)),
        compiler_params=pltpu.CompilerParams(
            dimension_semantics=("parallel",),
            vmem_limit_bytes=48 * 1024 * 1024,   # headroom below v7x's 64 MiB physical VMEM
        ),
    )(x, ln1_g, ln1_b, w_q, w_k, w_v, b_q, b_k, b_v, w_out_b, b_out,
      ln2_g, ln2_b, w1_b, b1, w2_b, b2)


def reference(x, params, n_heads):
    (ln1_g, ln1_b, w_in, b_in, w_out, b_out,
     ln2_g, ln2_b, w1, b1, w2, b2) = params
    B, S, D = x.shape
    d_head = D // n_heads

    def ln(v, g, b):
        mu = jnp.mean(v, -1, keepdims=True)
        var = jnp.mean((v - mu) ** 2, -1, keepdims=True)
        return (v - mu) / jnp.sqrt(var + 1e-5) * g + b

    res = x
    xn = ln(x, ln1_g, ln1_b)
    qkv = xn @ w_in + b_in
    q, k, v = jnp.split(qkv, 3, axis=-1)
    q = q.reshape(B, S, n_heads, d_head).transpose(0, 2, 1, 3)
    k = k.reshape(B, S, n_heads, d_head).transpose(0, 2, 1, 3)
    v = v.reshape(B, S, n_heads, d_head).transpose(0, 2, 1, 3)
    w = jnp.einsum('bhqd,bhkd->bhqk', q, k)
    mask = jnp.triu(jnp.ones((S, S), bool), 1)
    w = jnp.where(mask, -jnp.inf, w) / jnp.sqrt(jnp.float32(d_head))
    w = jax.nn.softmax(w, axis=-1)
    o = jnp.einsum('bhqk,bhkd->bhqd', w, v).transpose(0, 2, 1, 3).reshape(B, S, D)
    o = o @ w_out + b_out
    x = o + res
    res = x
    xn = ln(x, ln2_g, ln2_b)
    h = xn @ w1 + b1
    h = h * jax.nn.sigmoid(1.702 * h)
    return h @ w2 + b2 + res


if __name__ == "__main__":
    # D = 128 keeps every output store lane-dense; S multiple of 8 keeps sublanes full.
    B, S, D, H = 2, 16, 128, 4   # batch, seq, dim, n_heads  (d_head = 32)

    key = jax.random.PRNGKey(0)
    ks = jax.random.split(key, 16)

    x = jax.random.normal(ks[0], (B, S, D), jnp.float32)

    w_scale = 0.05
    params = (
        1.0 + 0.1 * jax.random.normal(ks[1], (1, D), jnp.float32),   # ln1 gamma
        0.1 * jax.random.normal(ks[2], (1, D), jnp.float32),         # ln1 beta
        w_scale * jax.random.normal(ks[3], (D, 3 * D), jnp.float32), # in_proj W
        w_scale * jax.random.normal(ks[4], (1, 3 * D), jnp.float32), # in_proj b
        w_scale * jax.random.normal(ks[5], (D, D), jnp.float32),     # out_proj W
        w_scale * jax.random.normal(ks[6], (1, D), jnp.float32),     # out_proj b
        1.0 + 0.1 * jax.random.normal(ks[7], (1, D), jnp.float32),   # ln2 gamma
        0.1 * jax.random.normal(ks[8], (1, D), jnp.float32),         # ln2 beta
        w_scale * jax.random.normal(ks[9], (D, 4 * D), jnp.float32), # linear_1 W
        w_scale * jax.random.normal(ks[10], (1, 4 * D), jnp.float32),# linear_1 b
        w_scale * jax.random.normal(ks[11], (4 * D, D), jnp.float32),# linear_2 W
        w_scale * jax.random.normal(ks[12], (1, D), jnp.float32),    # linear_2 b
    )

    out = clip_layer(x, params, H)
    out = jax.block_until_ready(out)

    ref = jax.block_until_ready(reference(x, params, H))
    # Tolerance accounts for bf16 matmul operands (f32 accumulation) vs. the f32 reference.
    np.testing.assert_allclose(np.asarray(out), np.asarray(ref), atol=2e-2, rtol=2e-2)
    assert not np.any(np.isnan(np.asarray(out)))

    print("KERNEL_OK")
</pallas_src>

<mosaic_0001>
module attributes {stable_mosaic.version = 11 : i64} {
  func.func @clip_layer_kernel(%arg0: i32, %arg1: memref<1x16x128xf32, #tpu.memory_space<vmem>>, %arg2: memref<1x128xf32, #tpu.memory_space<vmem>>, %arg3: memref<1x128xf32, #tpu.memory_space<vmem>>, %arg4: memref<128x128xbf16, #tpu.memory_space<vmem>>, %arg5: memref<128x128xbf16, #tpu.memory_space<vmem>>, %arg6: memref<128x128xbf16, #tpu.memory_space<vmem>>, %arg7: memref<1x128xf32, #tpu.memory_space<vmem>>, %arg8: memref<1x128xf32, #tpu.memory_space<vmem>>, %arg9: memref<1x128xf32, #tpu.memory_space<vmem>>, %arg10: memref<128x128xbf16, #tpu.memory_space<vmem>>, %arg11: memref<1x128xf32, #tpu.memory_space<vmem>>, %arg12: memref<1x128xf32, #tpu.memory_space<vmem>>, %arg13: memref<1x128xf32, #tpu.memory_space<vmem>>, %arg14: memref<128x512xbf16, #tpu.memory_space<vmem>>, %arg15: memref<1x512xf32, #tpu.memory_space<vmem>>, %arg16: memref<512x128xbf16, #tpu.memory_space<vmem>>, %arg17: memref<1x128xf32, #tpu.memory_space<vmem>>, %arg18: memref<1x16x128xf32, #tpu.memory_space<vmem>>) attributes {dimension_semantics = [#tpu.dimension_semantics<parallel>], iteration_bounds = array<i64: 2>, scalar_prefetch = 0 : i64, scratch_operands = 0 : i64, tpu.core_type = #tpu.core_type<tc>, window_params = [{transform_indices = @transform_0, window_bounds = array<i64: 1, 16, 128>}, {pipeline_mode = #tpu.pipeline_mode<synchronous>, transform_indices = @transform_1, window_bounds = array<i64: 1, 128>}, {pipeline_mode = #tpu.pipeline_mode<synchronous>, transform_indices = @transform_2, window_bounds = array<i64: 1, 128>}, {pipeline_mode = #tpu.pipeline_mode<synchronous>, transform_indices = @transform_3, window_bounds = array<i64: 128, 128>}, {pipeline_mode = #tpu.pipeline_mode<synchronous>, transform_indices = @transform_4, window_bounds = array<i64: 128, 128>}, {pipeline_mode = #tpu.pipeline_mode<synchronous>, transform_indices = @transform_5, window_bounds = array<i64: 128, 128>}, {pipeline_mode = #tpu.pipeline_mode<synchronous>, transform_indices = @transform_6, window_bounds = array<i64: 1, 128>}, {pipeline_mode = #tpu.pipeline_mode<synchronous>, transform_indices = @transform_7, window_bounds = array<i64: 1, 128>}, {pipeline_mode = #tpu.pipeline_mode<synchronous>, transform_indices = @transform_8, window_bounds = array<i64: 1, 128>}, {pipeline_mode = #tpu.pipeline_mode<synchronous>, transform_indices = @transform_9, window_bounds = array<i64: 128, 128>}, {pipeline_mode = #tpu.pipeline_mode<synchronous>, transform_indices = @transform_10, window_bounds = array<i64: 1, 128>}, {pipeline_mode = #tpu.pipeline_mode<synchronous>, transform_indices = @transform_11, window_bounds = array<i64: 1, 128>}, {pipeline_mode = #tpu.pipeline_mode<synchronous>, transform_indices = @transform_12, window_bounds = array<i64: 1, 128>}, {pipeline_mode = #tpu.pipeline_mode<synchronous>, transform_indices = @transform_13, window_bounds = array<i64: 128, 512>}, {pipeline_mode = #tpu.pipeline_mode<synchronous>, transform_indices = @transform_14, window_bounds = array<i64: 1, 512>}, {pipeline_mode = #tpu.pipeline_mode<synchronous>, transform_indices = @transform_15, window_bounds = array<i64: 512, 128>}, {pipeline_mode = #tpu.pipeline_mode<synchronous>, transform_indices = @transform_16, window_bounds = array<i64: 1, 128>}, {transform_indices = @transform_17, window_bounds = array<i64: 1, 16, 128>}]} {
    %c0 = arith.constant 0 : index
    %c0_0 = arith.constant 0 : index
    %c0_1 = arith.constant 0 : index
    %0 = vector.load %arg1[%c0, %c0_0, %c0_1] : memref<1x16x128xf32, #tpu.memory_space<vmem>>, vector<1x16x128xf32>
    %1 = vector.shape_cast %0 : vector<1x16x128xf32> to vector<16x128xf32>
    %c0_2 = arith.constant 0 : index
    %c0_3 = arith.constant 0 : index
    %2 = vector.load %arg2[%c0_2, %c0_3] : memref<1x128xf32, #tpu.memory_space<vmem>>, vector<1x128xf32>
    %c0_4 = arith.constant 0 : index
    %c0_5 = arith.constant 0 : index
    %3 = vector.load %arg3[%c0_4, %c0_5] : memref<1x128xf32, #tpu.memory_space<vmem>>, vector<1x128xf32>
    %cst = arith.constant dense<0.000000e+00> : vector<16xf32>
    %4 = vector.multi_reduction <add>, %1, %cst [1] : vector<16x128xf32> to vector<16xf32>
    %5 = vector.shape_cast %4 : vector<16xf32> to vector<16x1xf32>
    %cst_6 = arith.constant 1.280000e+02 : f32
    %6 = vector.broadcast %cst_6 : f32 to vector<16x1xf32>
    %7 = arith.divf %5, %6 : vector<16x1xf32>
    %8 = vector.broadcast %7 : vector<16x1xf32> to vector<16x128xf32>
    %9 = arith.subf %1, %8 : vector<16x128xf32>
    %10 = arith.mulf %9, %9 : vector<16x128xf32>
    %cst_7 = arith.constant dense<0.000000e+00> : vector<16xf32>
    %11 = vector.multi_reduction <add>, %10, %cst_7 [1] : vector<16x128xf32> to vector<16xf32>
    %12 = vector.shape_cast %11 : vector<16xf32> to vector<16x1xf32>
    %cst_8 = arith.constant 1.280000e+02 : f32
    %13 = vector.broadcast %cst_8 : f32 to vector<16x1xf32>
    %14 = arith.divf %12, %13 : vector<16x1xf32>
    %15 = vector.broadcast %7 : vector<16x1xf32> to vector<16x128xf32>
    %16 = arith.subf %1, %15 : vector<16x128xf32>
    %cst_9 = arith.constant 9.99999974E-6 : f32
    %17 = vector.broadcast %cst_9 : f32 to vector<16x1xf32>
    %18 = arith.addf %14, %17 : vector<16x1xf32>
    %19 = math.rsqrt %18 : vector<16x1xf32>
    %20 = vector.broadcast %19 : vector<16x1xf32> to vector<16x128xf32>
    %21 = arith.mulf %16, %20 : vector<16x128xf32>
    %22 = vector.broadcast %2 : vector<1x128xf32> to vector<16x128xf32>
    %23 = arith.mulf %21, %22 : vector<16x128xf32>
    %24 = vector.broadcast %3 : vector<1x128xf32> to vector<16x128xf32>
    %25 = arith.addf %23, %24 : vector<16x128xf32>
    %26 = arith.truncf %25 : vector<16x128xf32> to vector<16x128xbf16>
    %c0_10 = arith.constant 0 : index
    %c0_11 = arith.constant 0 : index
    %27 = vector.load %arg4[%c0_10, %c0_11] : memref<128x128xbf16, #tpu.memory_space<vmem>>, vector<128x128xbf16>
    %cst_12 = arith.constant dense<0.000000e+00> : vector<16x128xf32>
    %28 = tpu.matmul %26, %27, %cst_12 {dimension_numbers = #tpu.dot_dimension_numbers<[1], [0], [0], [1], [0, 0, 1, 1], [], []>} : vector<16x128xbf16>, vector<128x128xbf16>, vector<16x128xf32> -> vector<16x128xf32>
    %c0_13 = arith.constant 0 : index
    %c0_14 = arith.constant 0 : index
    %29 = vector.load %arg7[%c0_13, %c0_14] : memref<1x128xf32, #tpu.memory_space<vmem>>, vector<1x128xf32>
    %30 = vector.broadcast %29 : vector<1x128xf32> to vector<16x128xf32>
    %31 = arith.addf %28, %30 : vector<16x128xf32>
    %cst_15 = arith.constant 0.176776692 : f32
    %32 = vector.broadcast %cst_15 : f32 to vector<16x128xf32>
    %33 = arith.mulf %31, %32 : vector<16x128xf32>
    %c0_16 = arith.constant 0 : index
    %c0_17 = arith.constant 0 : index
    %34 = vector.load %arg5[%c0_16, %c0_17] : memref<128x128xbf16, #tpu.memory_space<vmem>>, vector<128x128xbf16>
    %cst_18 = arith.constant dense<0.000000e+00> : vector<16x128xf32>
    %35 = tpu.matmul %26, %34, %cst_18 {dimension_numbers = #tpu.dot_dimension_numbers<[1], [0], [0], [1], [0, 0, 1, 1], [], []>} : vector<16x128xbf16>, vector<128x128xbf16>, vector<16x128xf32> -> vector<16x128xf32>
    %c0_19 = arith.constant 0 : index
    %c0_20 = arith.constant 0 : index
    %36 = vector.load %arg8[%c0_19, %c0_20] : memref<1x128xf32, #tpu.memory_space<vmem>>, vector<1x128xf32>
    %37 = vector.broadcast %36 : vector<1x128xf32> to vector<16x128xf32>
    %38 = arith.addf %35, %37 : vector<16x128xf32>
    %c0_21 = arith.constant 0 : index
    %c0_22 = arith.constant 0 : index
    %39 = vector.load %arg6[%c0_21, %c0_22] : memref<128x128xbf16, #tpu.memory_space<vmem>>, vector<128x128xbf16>
    %cst_23 = arith.constant dense<0.000000e+00> : vector<16x128xf32>
    %40 = tpu.matmul %26, %39, %cst_23 {dimension_numbers = #tpu.dot_dimension_numbers<[1], [0], [0], [1], [0, 0, 1, 1], [], []>} : vector<16x128xbf16>, vector<128x128xbf16>, vector<16x128xf32> -> vector<16x128xf32>
    %c0_24 = arith.constant 0 : index
    %c0_25 = arith.constant 0 : index
    %41 = vector.load %arg9[%c0_24, %c0_25] : memref<1x128xf32, #tpu.memory_space<vmem>>, vector<1x128xf32>
    %42 = vector.broadcast %41 : vector<1x128xf32> to vector<16x128xf32>
    %43 = arith.addf %40, %42 : vector<16x128xf32>
    %44 = arith.truncf %33 : vector<16x128xf32> to vector<16x128xbf16>
    %45 = vector.shape_cast %44 : vector<16x128xbf16> to vector<16x4x32xbf16>
    %46 = tpu.transpose %45, [1, 0, 2] : vector<16x4x32xbf16> -> vector<4x16x32xbf16>
    %47 = arith.truncf %38 : vector<16x128xf32> to vector<16x128xbf16>
    %48 = vector.shape_cast %47 : vector<16x128xbf16> to vector<16x4x32xbf16>
    %49 = tpu.transpose %48, [1, 0, 2] : vector<16x4x32xbf16> -> vector<4x16x32xbf16>
    %50 = arith.truncf %43 : vector<16x128xf32> to vector<16x128xbf16>
    %51 = vector.shape_cast %50 : vector<16x128xbf16> to vector<16x4x32xbf16>
    %52 = tpu.transpose %51, [1, 0, 2] : vector<16x4x32xbf16> -> vector<4x16x32xbf16>
    "tpu.trace_start"() <{level = 10 : i32, message = "hqd,hkd->hqk"}> : () -> ()
    %cst_26 = arith.constant dense<0.000000e+00> : vector<4x16x16xf32>
    %53 = tpu.matmul %46, %49, %cst_26 {dimension_numbers = #tpu.dot_dimension_numbers<[2], [2], [1], [1], [0, 0, 0, 1, 1, 1], [0], [0]>} : vector<4x16x32xbf16>, vector<4x16x32xbf16>, vector<4x16x16xf32> -> vector<4x16x16xf32>
    "tpu.trace_stop"() : () -> ()
    %54 = tpu.iota {dimensions = array<i32: 0>} : vector<16x16xi32>
    %55 = tpu.iota {dimensions = array<i32: 1>} : vector<16x16xi32>
    %56 = arith.cmpi sgt, %55, %54 : vector<16x16xi32>
    %57 = vector.shape_cast %56 : vector<16x16xi1> to vector<1x16x16xi1>
    %cst_27 = arith.constant -1.000000e+30 : f32
    %58 = vector.shape_cast %57 : vector<1x16x16xi1> to vector<1x16x16xi1>
    %59 = vector.broadcast %58 : vector<1x16x16xi1> to vector<4x16x16xi1>
    %60 = vector.broadcast %cst_27 : f32 to vector<4x16x16xf32>
    %61 = arith.select %59, %60, %53 : vector<4x16x16xi1>, vector<4x16x16xf32>
    %cst_28 = arith.constant dense<0xFF800000> : vector<4x16xf32>
    %62 = vector.multi_reduction <maximumf>, %61, %cst_28 [2] : vector<4x16x16xf32> to vector<4x16xf32>
    %63 = vector.shape_cast %62 : vector<4x16xf32> to vector<4x16x1xf32>
    %64 = vector.broadcast %63 : vector<4x16x1xf32> to vector<4x16x16xf32>
    %65 = arith.subf %61, %64 : vector<4x16x16xf32>
    %66 = math.exp %65 : vector<4x16x16xf32>
    %cst_29 = arith.constant dense<0.000000e+00> : vector<4x16xf32>
    %67 = vector.multi_reduction <add>, %66, %cst_29 [2] : vector<4x16x16xf32> to vector<4x16xf32>
    %68 = vector.shape_cast %67 : vector<4x16xf32> to vector<4x16x1xf32>
    %69 = tpu.reciprocal %68 {approx = true} : vector<4x16x1xf32> -> vector<4x16x1xf32>
    %70 = vector.broadcast %69 : vector<4x16x1xf32> to vector<4x16x16xf32>
    %71 = arith.mulf %66, %70 : vector<4x16x16xf32>
    %72 = arith.truncf %71 : vector<4x16x16xf32> to vector<4x16x16xbf16>
    "tpu.trace_start"() <{level = 10 : i32, message = "hqk,hkd->hqd"}> : () -> ()
    %cst_30 = arith.constant dense<0.000000e+00> : vector<4x16x32xf32>
    %73 = tpu.matmul %72, %52, %cst_30 {dimension_numbers = #tpu.dot_dimension_numbers<[2], [1], [1], [2], [0, 0, 0, 1, 1, 2], [0], [0]>} : vector<4x16x16xbf16>, vector<4x16x32xbf16>, vector<4x16x32xf32> -> vector<4x16x32xf32>
    "tpu.trace_stop"() : () -> ()
    %74 = tpu.transpose %73, [1, 0, 2] : vector<4x16x32xf32> -> vector<16x4x32xf32>
    %75 = vector.shape_cast %74 : vector<16x4x32xf32> to vector<16x128xf32>
    %76 = arith.truncf %75 : vector<16x128xf32> to vector<16x128xbf16>
    %c0_31 = arith.constant 0 : index
    %c0_32 = arith.constant 0 : index
    %77 = vector.load %arg10[%c0_31, %c0_32] : memref<128x128xbf16, #tpu.memory_space<vmem>>, vector<128x128xbf16>
    %cst_33 = arith.constant dense<0.000000e+00> : vector<16x128xf32>
    %78 = tpu.matmul %76, %77, %cst_33 {dimension_numbers = #tpu.dot_dimension_numbers<[1], [0], [0], [1], [0, 0, 1, 1], [], []>} : vector<16x128xbf16>, vector<128x128xbf16>, vector<16x128xf32> -> vector<16x128xf32>
    %c0_34 = arith.constant 0 : index
    %c0_35 = arith.constant 0 : index
    %79 = vector.load %arg11[%c0_34, %c0_35] : memref<1x128xf32, #tpu.memory_space<vmem>>, vector<1x128xf32>
    %80 = vector.broadcast %79 : vector<1x128xf32> to vector<16x128xf32>
    %81 = arith.addf %78, %80 : vector<16x128xf32>
    %82 = arith.addf %81, %1 : vector<16x128xf32>
    %c0_36 = arith.constant 0 : index
    %c0_37 = arith.constant 0 : index
    %83 = vector.load %arg12[%c0_36, %c0_37] : memref<1x128xf32, #tpu.memory_space<vmem>>, vector<1x128xf32>
    %c0_38 = arith.constant 0 : index
    %c0_39 = arith.constant 0 : index
    %84 = vector.load %arg13[%c0_38, %c0_39] : memref<1x128xf32, #tpu.memory_space<vmem>>, vector<1x128xf32>
    %cst_40 = arith.constant dense<0.000000e+00> : vector<16xf32>
    %85 = vector.multi_reduction <add>, %82, %cst_40 [1] : vector<16x128xf32> to vector<16xf32>
    %86 = vector.shape_cast %85 : vector<16xf32> to vector<16x1xf32>
    %cst_41 = arith.constant 1.280000e+02 : f32
    %87 = vector.broadcast %cst_41 : f32 to vector<16x1xf32>
    %88 = arith.divf %86, %87 : vector<16x1xf32>
    %89 = vector.broadcast %88 : vector<16x1xf32> to vector<16x128xf32>
    %90 = arith.subf %82, %89 : vector<16x128xf32>
    %91 = arith.mulf %90, %90 : vector<16x128xf32>
    %cst_42 = arith.constant dense<0.000000e+00> : vector<16xf32>
    %92 = vector.multi_reduction <add>, %91, %cst_42 [1] : vector<16x128xf32> to vector<16xf32>
    %93 = vector.shape_cast %92 : vector<16xf32> to vector<16x1xf32>
    %cst_43 = arith.constant 1.280000e+02 : f32
    %94 = vector.broadcast %cst_43 : f32 to vector<16x1xf32>
    %95 = arith.divf %93, %94 : vector<16x1xf32>
    %96 = vector.broadcast %88 : vector<16x1xf32> to vector<16x128xf32>
    %97 = arith.subf %82, %96 : vector<16x128xf32>
    %cst_44 = arith.constant 9.99999974E-6 : f32
    %98 = vector.broadcast %cst_44 : f32 to vector<16x1xf32>
    %99 = arith.addf %95, %98 : vector<16x1xf32>
    %100 = math.rsqrt %99 : vector<16x1xf32>
    %101 = vector.broadcast %100 : vector<16x1xf32> to vector<16x128xf32>
    %102 = arith.mulf %97, %101 : vector<16x128xf32>
    %103 = vector.broadcast %83 : vector<1x128xf32> to vector<16x128xf32>
    %104 = arith.mulf %102, %103 : vector<16x128xf32>
    %105 = vector.broadcast %84 : vector<1x128xf32> to vector<16x128xf32>
    %106 = arith.addf %104, %105 : vector<16x128xf32>
    %107 = arith.truncf %106 : vector<16x128xf32> to vector<16x128xbf16>
    %c0_45 = arith.constant 0 : index
    %c0_46 = arith.constant 0 : index
    %108 = vector.load %arg14[%c0_45, %c0_46] : memref<128x512xbf16, #tpu.memory_space<vmem>>, vector<128x512xbf16>
    %cst_47 = arith.constant dense<0.000000e+00> : vector<16x512xf32>
    %109 = tpu.matmul %107, %108, %cst_47 {dimension_numbers = #tpu.dot_dimension_numbers<[1], [0], [0], [1], [0, 0, 1, 1], [], []>} : vector<16x128xbf16>, vector<128x512xbf16>, vector<16x512xf32> -> vector<16x512xf32>
    %c0_48 = arith.constant 0 : index
    %c0_49 = arith.constant 0 : index
    %110 = vector.load %arg15[%c0_48, %c0_49] : memref<1x512xf32, #tpu.memory_space<vmem>>, vector<1x512xf32>
    %111 = vector.broadcast %110 : vector<1x512xf32> to vector<16x512xf32>
    %112 = arith.addf %109, %111 : vector<16x512xf32>
    %cst_50 = arith.constant 1.702000e+00 : f32
    %113 = vector.broadcast %cst_50 : f32 to vector<16x512xf32>
    %114 = arith.mulf %113, %112 : vector<16x512xf32>
    %115 = arith.negf %114 : vector<16x512xf32>
    %116 = math.exp %115 : vector<16x512xf32>
    %cst_51 = arith.constant 1.000000e+00 : f32
    %117 = vector.broadcast %cst_51 : f32 to vector<16x512xf32>
    %118 = arith.addf %117, %116 : vector<16x512xf32>
    %119 = arith.divf %117, %118 : vector<16x512xf32>
    %120 = arith.mulf %112, %119 : vector<16x512xf32>
    %121 = arith.truncf %120 : vector<16x512xf32> to vector<16x512xbf16>
    %c0_52 = arith.constant 0 : index
    %c0_53 = arith.constant 0 : index
    %122 = vector.load %arg16[%c0_52, %c0_53] : memref<512x128xbf16, #tpu.memory_space<vmem>>, vector<512x128xbf16>
    %cst_54 = arith.constant dense<0.000000e+00> : vector<16x128xf32>
    %123 = tpu.matmul %121, %122, %cst_54 {dimension_numbers = #tpu.dot_dimension_numbers<[1], [0], [0], [1], [0, 0, 1, 1], [], []>} : vector<16x512xbf16>, vector<512x128xbf16>, vector<16x128xf32> -> vector<16x128xf32>
    %c0_55 = arith.constant 0 : index
    %c0_56 = arith.constant 0 : index
    %124 = vector.load %arg17[%c0_55, %c0_56] : memref<1x128xf32, #tpu.memory_space<vmem>>, vector<1x128xf32>
    %125 = vector.broadcast %124 : vector<1x128xf32> to vector<16x128xf32>
    %126 = arith.addf %123, %125 : vector<16x128xf32>
    %127 = arith.addf %126, %82 : vector<16x128xf32>
    %c0_57 = arith.constant 0 : index
    %c0_58 = arith.constant 0 : index
    %c0_59 = arith.constant 0 : index
    %128 = vector.load %arg18[%c0_57, %c0_58, %c0_59] : memref<1x16x128xf32, #tpu.memory_space<vmem>>, vector<1x16x128xf32>
    %129 = vector.shape_cast %128 : vector<1x16x128xf32> to vector<16x128xf32>
    %130 = vector.shape_cast %127 : vector<16x128xf32> to vector<1x16x128xf32>
    tpu.vector_store %arg18[%c0_57, %c0_58, %c0_59], %130 {strides = array<i32>} : memref<1x16x128xf32, #tpu.memory_space<vmem>>, vector<1x16x128xf32>,
    return
  }
  func.func @transform_0(%arg0: i32) -> (i32, i32, i32) {
    %c0_i32 = arith.constant 0 : i32
    %c0_i32_0 = arith.constant 0 : i32
    %c0_i32_1 = arith.constant 0 : i32
    return %arg0, %c0_i32, %c0_i32_0 : i32, i32, i32
  }
  func.func @transform_1(%arg0: i32) -> (i32, i32) {
    %c0_i32 = arith.constant 0 : i32
    %c0_i32_0 = arith.constant 0 : i32
    %c0_i32_1 = arith.constant 0 : i32
    return %c0_i32, %c0_i32_0 : i32, i32
  }
  func.func @transform_2(%arg0: i32) -> (i32, i32) {
    %c0_i32 = arith.constant 0 : i32
    %c0_i32_0 = arith.constant 0 : i32
    %c0_i32_1 = arith.constant 0 : i32
    return %c0_i32, %c0_i32_0 : i32, i32
  }
  func.func @transform_3(%arg0: i32) -> (i32, i32) {
    %c0_i32 = arith.constant 0 : i32
    %c0_i32_0 = arith.constant 0 : i32
    %c0_i32_1 = arith.constant 0 : i32
    return %c0_i32, %c0_i32_0 : i32, i32
  }
  func.func @transform_4(%arg0: i32) -> (i32, i32) {
    %c0_i32 = arith.constant 0 : i32
    %c0_i32_0 = arith.constant 0 : i32
    %c0_i32_1 = arith.constant 0 : i32
    return %c0_i32, %c0_i32_0 : i32, i32
  }
  func.func @transform_5(%arg0: i32) -> (i32, i32) {
    %c0_i32 = arith.constant 0 : i32
    %c0_i32_0 = arith.constant 0 : i32
    %c0_i32_1 = arith.constant 0 : i32
    return %c0_i32, %c0_i32_0 : i32, i32
  }
  func.func @transform_6(%arg0: i32) -> (i32, i32) {
    %c0_i32 = arith.constant 0 : i32
    %c0_i32_0 = arith.constant 0 : i32
    %c0_i32_1 = arith.constant 0 : i32
    return %c0_i32, %c0_i32_0 : i32, i32
  }
  func.func @transform_7(%arg0: i32) -> (i32, i32) {
    %c0_i32 = arith.constant 0 : i32
    %c0_i32_0 = arith.constant 0 : i32
    %c0_i32_1 = arith.constant 0 : i32
    return %c0_i32, %c0_i32_0 : i32, i32
  }
  func.func @transform_8(%arg0: i32) -> (i32, i32) {
    %c0_i32 = arith.constant 0 : i32
    %c0_i32_0 = arith.constant 0 : i32
    %c0_i32_1 = arith.constant 0 : i32
    return %c0_i32, %c0_i32_0 : i32, i32
  }
  func.func @transform_9(%arg0: i32) -> (i32, i32) {
    %c0_i32 = arith.constant 0 : i32
    %c0_i32_0 = arith.constant 0 : i32
    %c0_i32_1 = arith.constant 0 : i32
    return %c0_i32, %c0_i32_0 : i32, i32
  }
  func.func @transform_10(%arg0: i32) -> (i32, i32) {
    %c0_i32 = arith.constant 0 : i32
    %c0_i32_0 = arith.constant 0 : i32
    %c0_i32_1 = arith.constant 0 : i32
    return %c0_i32, %c0_i32_0 : i32, i32
  }
  func.func @transform_11(%arg0: i32) -> (i32, i32) {
    %c0_i32 = arith.constant 0 : i32
    %c0_i32_0 = arith.constant 0 : i32
    %c0_i32_1 = arith.constant 0 : i32
    return %c0_i32, %c0_i32_0 : i32, i32
  }
  func.func @transform_12(%arg0: i32) -> (i32, i32) {
    %c0_i32 = arith.constant 0 : i32
    %c0_i32_0 = arith.constant 0 : i32
    %c0_i32_1 = arith.constant 0 : i32
    return %c0_i32, %c0_i32_0 : i32, i32
  }
  func.func @transform_13(%arg0: i32) -> (i32, i32) {
    %c0_i32 = arith.constant 0 : i32
    %c0_i32_0 = arith.constant 0 : i32
    %c0_i32_1 = arith.constant 0 : i32
    return %c0_i32, %c0_i32_0 : i32, i32
  }
  func.func @transform_14(%arg0: i32) -> (i32, i32) {
    %c0_i32 = arith.constant 0 : i32
    %c0_i32_0 = arith.constant 0 : i32
    %c0_i32_1 = arith.constant 0 : i32
    return %c0_i32, %c0_i32_0 : i32, i32
  }
  func.func @transform_15(%arg0: i32) -> (i32, i32) {
    %c0_i32 = arith.constant 0 : i32
    %c0_i32_0 = arith.constant 0 : i32
    %c0_i32_1 = arith.constant 0 : i32
    return %c0_i32, %c0_i32_0 : i32, i32
  }
  func.func @transform_16(%arg0: i32) -> (i32, i32) {
    %c0_i32 = arith.constant 0 : i32
    %c0_i32_0 = arith.constant 0 : i32
    %c0_i32_1 = arith.constant 0 : i32
    return %c0_i32, %c0_i32_0 : i32, i32
  }
  func.func @transform_17(%arg0: i32) -> (i32, i32, i32) {
    %c0_i32 = arith.constant 0 : i32
    %c0_i32_0 = arith.constant 0 : i32
    %c0_i32_1 = arith.constant 0 : i32
    return %arg0, %c0_i32, %c0_i32_0 : i32, i32, i32
  }
}

</mosaic_0001>

<bundles_post_ra>
// kernel: tpu_custom_call.1
= control target key start
LH: loop header
LB: loop body
LE: loop exit
PB: predicated region body
PF: predicated region fallthrough
CT: control target
= control target key end

     0   :  { %s5504_s0 = inlined_call_operand.hbm [shape: f32[2,16,128], index: 0, kind: input, shape index: {}]   ;;  %s5505_s1 = inlined_call_operand.hbm [shape: f32[1,128], index: 1, kind: input, shape index: {}]   ;;  %s5506_s2 = inlined_call_operand.vmem [shape: f32[1,128], index: 2, kind: input, shape index: {}]   ;;  %s5507_s3 = inlined_call_operand.hbm [shape: bf16[128,128], index: 3, kind: input, shape index: {}]   ;;  %s5508_s4 = inlined_call_operand.hbm [shape: bf16[128,128], index: 4, kind: input, shape index: {}]   ;;  %s5509_s5 = inlined_call_operand.hbm [shape: bf16[128,128], index: 5, kind: input, shape index: {}]   ;;  %s5510_s6 = inlined_call_operand.vmem [shape: f32[1,128], index: 6, kind: input, shape index: {}]   ;;  %s5511_s7 = inlined_call_operand.vmem [shape: f32[1,128], index: 7, kind: input, shape index: {}]   ;;  %s5512_s8 = inlined_call_operand.hbm [shape: f32[1,128], index: 8, kind: input, shape index: {}]   ;;  %s5513_s9 = inlined_call_operand.hbm [shape: bf16[128,128], index: 9, kind: input, shape index: {}]   ;;  %s5514_s10 = inlined_call_operand.vmem [shape: f32[1,128], index: 10, kind: input, shape index: {}]   ;;  %s5515_s11 = inlined_call_operand.vmem [shape: f32[1,128], index: 11, kind: input, shape index: {}]   ;;  %s5516_s12 = inlined_call_operand.vmem [shape: f32[1,128], index: 12, kind: input, shape index: {}]   ;;  %s5517_s13 = inlined_call_operand.hbm [shape: bf16[128,512], index: 13, kind: input, shape index: {}]   ;;  %s5518_s14 = inlined_call_operand.vmem [shape: f32[1,512], index: 14, kind: input, shape index: {}]   ;;  %s5519_s15 = inlined_call_operand.hbm [shape: bf16[512,128], index: 15, kind: input, shape index: {}]   ;;  %s5520_s16 = inlined_call_operand.vmem [shape: f32[1,128], index: 16, kind: input, shape index: {}]   ;;  %s5521_s17 = inlined_call_operand.hbm [shape: f32[2,16,128], index: 17, kind: output, shape index: {}]  }
   0x1   :  { %5528 = sst [smem:[#allocation24_spill]] %s5504_s0 }
   0x2   :  { %5529 = sst [smem:[#allocation25_spill]] %s5505_s1 }
   0x3   :  { %5530 = sst [smem:[#allocation26_spill]] %s5507_s3 }
   0x4   :  { %5531 = sst [smem:[#allocation27_spill]] %s5508_s4 }
   0x5   :  { %5532 = sst [smem:[#allocation28_spill]] %s5509_s5 }
   0x6   :  { %5533 = sst [smem:[#allocation29_spill]] %s5512_s8 }
   0x7   :  { %5534 = sst [smem:[#allocation30_spill]] %s5513_s9 }
   0x8   :  { %5535 = sst [smem:[#allocation31_spill]] %s5516_s12 }
   0x9   :  { %5536 = sst [smem:[#allocation32_spill]] %s5517_s13 }
   0xa   :  { %5537 = sst [smem:[#allocation33_spill]] %s5518_s14 }
   0xb   :  { %5538 = sst [smem:[#allocation34_spill]] %s5519_s15 }
   0xc   :  { %5539 = sst [smem:[#allocation35_spill]] %s5520_s16 }
   0xd   :  { %5540 = sst [smem:[#allocation36_spill]] %s5521_s17 }
   0xe   :  { %22 = vsyncpa [#allocation3], 0 }
   0xf   :  { %24 = vsyncpa [#allocation3 + $0x1], 0 }
  0x10   :  { %25 = vsyncpa [#allocation6], 0 }
  0x11   :  { %26 = vsyncpa [#allocation9], 0 }
  0x12   :  { %27 = vsyncpa [#allocation12], 0 }
  0x13   :  { %28 = vsyncpa [#allocation15], 0 }
  0x14   :  { %29 = vsyncpa [#allocation4], 0 }
  0x15   :  { %31 = vsyncpa [#allocation4 + $0x1], 0  ;;  %s4607_s24 = smov 0   ;;  %s4609_s25 = smov 0  }
  0x16   :  { %s4611_s26 = smov 0   ;;  %s4613_s27 = smov 0  }
  0x17 LB: > { %s5541_s0 = sld [smem:[#allocation25_spill]]  ;;  %s4631_s18 = sadd.s32 4294967295, %s4493_s27   ;;  %s4493_s27 = sphi %s4613_s27, %s5581_s27   ;;  %s4489_s26 = sphi %s4611_s26, %s5580_s26   ;;  %s4485_s25 = sphi %s4609_s25, %s5579_s25   ;;  %s4481_s24 = sphi %s4607_s24, %s5578_s24  }
  0x18   : > { %p3373_p0 = scmp.ge.s32.totalorder %s4493_s27, 1  ;;  %p58_p1 = scmp.eq.s32.totalorder %s4631_s18, 0 }
  0x19   : > { %p430_p2 = scmp.lt.s32.totalorder %s4493_s27, 3  ;;  %s4495_s1 = smov [#allocation5]  }
  0x1a   : > { %s444_s20 = sshll.u32 %s4495_s1, 4  ;;  %s5543_s4 = sld [smem:[#allocation27_spill]]  ;;  %s445_s20 = int_to_ptr.vmem [resolvable:$true] %s444_s20 }
  0x1b   : > { %p4636_p3 = pnand %p3373_p0, %p430_p2  ;;  %s5545_s8 = sld [smem:[#allocation29_spill]] }
  0x1c   : > { %s4496_s17 = smov [#allocation8]   ;;  %s5524_s21 = smov 64  }
  0x1d   : > { %s442_s30 = sshll.u32 %s5541_s0, 4  ;;  %p3936_p5 = pneg %p4636_p3  ;;  %s443_s30 = int_to_ptr.hbm [resolvable:$true] %s442_s30 }
  0x1e   : > { %s472_s16 = sshll.u32 %s4496_s17, 4  ;;  %s5526_s22 = smov 4   ;;  %s473_s16 = int_to_ptr.vmem [resolvable:$true] %s472_s16 }
  0x1f   : > { %p4648_p6 = pnand %p3936_p5, %p58_p1  ;;  %s5546_s13 = sld [smem:[#allocation32_spill]] }
  0x20   : > { %s470_s23 = sshll.u32 %s5543_s4, 4  ;;  %s4499_s29 = smov [#allocation11]   ;;  %s471_s23 = int_to_ptr.hbm [resolvable:$true] %s470_s23 }
  0x21   : > { %s505_s1 = sshll.u32 %s5545_s8, 4  ;;  %s507_s0 = sshll.u32 %s4499_s29, 4  ;;  %s506_s1 = int_to_ptr.hbm [resolvable:$true] %s505_s1  ;;  %s508_s0 = int_to_ptr.vmem [resolvable:$true] %s507_s0 }
  0x22   : > { %3939 = dma.hbm_to_vmem [thread:$0]  (!%p4648_p6), %s443_s30, 16, %s445_s20, [#allocation6]  }
  0x23   : > { %3945 = dma.hbm_to_vmem [thread:$0]  (!%p4648_p6), %s471_s23, 1024, %s473_s16, [#allocation9], %s5524_s21, %s5524_s21, %s5526_s22  }
  0x24   : > { %3951 = dma.hbm_to_vmem [thread:$0]  (!%p4648_p6), %s506_s1, 16, %s508_s0, [#allocation12]  }
  0x25   : > { %s539_s12 = sshll.u32 %s5546_s13, 4  ;;  %s4500_s17 = smov [#allocation14]   ;;  %s540_s12 = int_to_ptr.hbm [resolvable:$true] %s539_s12 }
  0x26   : > { %s541_s30 = sshll.u32 %s4500_s17, 4  ;;  %s4501_s20 = smov 256   ;;  %s542_s30 = int_to_ptr.vmem [resolvable:$true] %s541_s30 }
  0x27   : > { %s4502_s8 = smov 16   ;;  %s5547_s3 = sld [smem:[#allocation26_spill]] }
  0x28   : > { %3957 = dma.hbm_to_vmem [thread:$0]  (!%p4648_p6), %s540_s12, 4096, %s542_s30, [#allocation15], %s4501_s20, %s4501_s20, %s4502_s8  }
  0x29   : > { %s4503_s14 = smov [#allocation7]   ;;  %s5548_s5 = sld [smem:[#allocation28_spill]] }
  0x2a   : > { %s458_s29 = sshll.u32 %s4503_s14, 4  ;;  %s5549_s0 = smov 4   ;;  %s459_s29 = int_to_ptr.vmem [resolvable:$true] %s458_s29 }
  0x2b   : > { %s5550_s17 = smov 64   ;;  %s4504_s8 = smov [#allocation10]  }
  0x2c   : > { %s486_s12 = sshll.u32 %s4504_s8, 4  ;;  %s5551_s9 = sld [smem:[#allocation30_spill]]  ;;  %s487_s12 = int_to_ptr.vmem [resolvable:$true] %s486_s12 }
  0x2d   : > { %s456_s4 = sshll.u32 %s5547_s3, 4  ;;  %s5552_s15 = sld [smem:[#allocation34_spill]]  ;;  %s457_s4 = int_to_ptr.hbm [resolvable:$true] %s456_s4 }
  0x2e   : > { %3942 = dma.hbm_to_vmem [thread:$0]  (!%p4648_p6), %s457_s4, 1024, %s459_s29, [#allocation6], %s5550_s17, %s5550_s17, %s5549_s0  }
  0x2f   : > { %s484_s1 = sshll.u32 %s5548_s5, 4  ;;  %s4505_s4 = smov [#allocation13]   ;;  %s485_s1 = int_to_ptr.hbm [resolvable:$true] %s484_s1 }
  0x30   : > { %3948 = dma.hbm_to_vmem [thread:$0]  (!%p4648_p6), %s485_s1, 1024, %s487_s12, [#allocation9], %s5550_s17, %s5550_s17, %s5549_s0  }
  0x31   : > { %s518_s14 = sshll.u32 %s4505_s4, 4  ;;  %s4506_s29 = smov [#allocation16]   ;;  %s519_s14 = int_to_ptr.vmem [resolvable:$true] %s518_s14 }
  0x32   : > { %s516_s16 = sshll.u32 %s5551_s9, 4  ;;  %s558_s1 = sshll.u32 %s4506_s29, 4  ;;  %s517_s16 = int_to_ptr.hbm [resolvable:$true] %s516_s16  ;;  %s559_s1 = int_to_ptr.vmem [resolvable:$true] %s558_s1 }
  0x33   : > { %s556_s23 = sshll.u32 %s5552_s15, 4  ;;  %s3372_s8 = sadd.s32 4294967294, %s4493_s27   ;;  %s557_s23 = int_to_ptr.hbm [resolvable:$true] %s556_s23 }
  0x34   : > { %3954 = dma.hbm_to_vmem [thread:$0]  (!%p4648_p6), %s517_s16, 1024, %s519_s14, [#allocation12], %s5550_s17, %s5550_s17, %s5549_s0  }
  0x35   : > { %3960 = dma.hbm_to_vmem [thread:$0]  (!%p4648_p6), %s557_s23, 4096, %s559_s1, [#allocation15], %s5550_s17, %s5550_s17, %s5549_s0  }
  0x36   : > { %s4703_s12 = sadd.s32 1, %s4493_s27   ;;  %s44_s20 = sadd.s32 1, %s4489_s26 }
  0x37   : > { %s41_s30 = ssub.s32 %s4493_s27, %s4703_s12  ;;  %p51_p8 = scmp.ne.s32.totalorder %s4489_s26, %s4485_s25 }
  0x38   : > { %p42_p7 = scmp.eq.s32.totalorder %s41_s30, 0  ;;  %p52_p9 = scmp.eq.s32.totalorder %s4493_s27, 0 }
  0x39   : > { %p57_p10 = scmp.ne.s32.totalorder %s4485_s25, %s4481_s24  ;;  %p417_p13 = scmp.eq.s32.totalorder %s4631_s18, 1 }
  0x3a   : > { %s4714_s16 = scalar_select %p42_p7, %s4489_s26, %s44_s20  }
  0x3b   : > { %p4716_p11 = por %p52_p9, %p51_p8  ;;  %p4722_p12 = por %p58_p1, %p57_p10 }
  0x3c   : > { %p423_p0 = scmp.eq.s32.totalorder %s3372_s8, 1  ;;  %p3977_p2 = scmp.lt.s32.totalorder %s4493_s27, 2 }
  0x3d   : > { %s575_s17 = sand.u32 1, %s4489_s26   ;;  %p4729_p5 = por %p417_p13, %p51_p8 }
  0x3e   : > { %p4733_p6 = por %p423_p0, %p57_p10  ;;  %s3383_s23 = sshll.u32 %s575_s17, 4 }
  0x3f   : > { %s3802_s4 = sshll.u32 %s4493_s27, 4  ;;  %s5557_s1 = sld [smem:[#allocation24_spill]] }
  0x40   : > { %s579_s20 = scalar_lea.vmem [#allocation2], %s3383_s23  ;;  %p4743_p7 = pnand %p3977_p2, %p4716_p11 }
  0x41   : > { %s587_s3 = sshll.u32 %s579_s20, 4  ;;  %s576_s9 = scalar_lea.sflag [#allocation3], %s575_s17  ;;  %s588_s3 = int_to_ptr.vmem [resolvable:$true] %s587_s3 }
  0x42   : > { %p4385_p9 = pneg %p4743_p7 }
  0x45   : > { %s584_s30 = scalar_lea.hbm %s5557_s1, %s3802_s4  ;;  %s4388_s14 = scalar_lea.hbm %s5557_s1, 32 }
  0x46   : > { %s585_s5 = sshll.u32 %s584_s30, 4  ;;  %s586_s5 = int_to_ptr.hbm [resolvable:$true] %s585_s5 }
  0x47   : > { %s4381_s13 = sshra.s32 %s586_s5, 4  ;;  %s4382_s13 = int_to_ptr.hbm [resolvable:$true] %s4381_s13 }
  0x48   : > { %s4383_s15 = scalar_lea.hbm %s4382_s13, 16  ;;  %p4389_p11 = scmp.lt.s32.totalorder %s4382_s13, %s5557_s1 }
  0x49   : > { %p4384_p8 = scmp.ne.s32.totalorder %s4382_s13, %s4383_s15  ;;  %p4390_p0 = scmp.lt.s32.totalorder %s4388_s14, %s4383_s15 }
  0x4b   : > { %p4386_p10 = pnand %p4385_p9, %p4384_p8  ;;  %p4391_p2 = por %p4390_p0, %p4389_p11 }
  0x4d   : > { %p4387_p13 = pneg %p4386_p10 }
  0x4f   : > { %p4392_p4 = pnand %p4391_p2, %p4387_p13 }
  0x51   : > { %4395 = shalt.err (!%p4392_p4)
}
  0x52   : > { %s4507_s17 = smov 128   ;;  %s4508_s30 = smov 8  }
  0x53   : > { %3964 = dma.hbm_to_vmem [thread:$0]  (!%p4743_p7), %s586_s5, 256, %s588_s3, %s576_s9, %s4507_s17, %s4507_s17, %s4508_s30  }
  0x54   : > { %599 = sbr.rel (%p4636_p3) target bundleno = 2155 (0x86b), region = 88  ;;  %s4760_s20 = sand.u32 (!%p4636_p3), 1, %s4485_s25  }
  0x55   : > { %s3387_s13 = sshll.u32 (!%p4636_p3), %s4760_s20, 4  ;;  %s602_s15 = scalar_lea.sflag (!%p4636_p3), [#allocation3], %s4760_s20 }
  0x56   : > { %s4766_s23 = scalar_lea.vmem (!%p4636_p3), [#allocation2], %s3387_s13 }
  0x59   : > { %4456 = dma.done.wait (%p4722_p12), %s602_s15, 256  }
  0x5a   : > { %4458 = vsyncadd (%p4722_p12), %s602_s15, 4294967040 }
  0x5b   : > { %4460 = dma.done.wait (%p58_p1), [#allocation6], 1040  }
  0x5c   : > { %4462 = vsyncadd (%p58_p1), [#allocation6], 4294966256 }
  0x5d   : > { %4464 = dma.done.wait (%p58_p1), [#allocation9], 2048  }
  0x5e   : > { %4466 = vsyncadd (%p58_p1), [#allocation9], 4294965248 }
  0x5f   : > { %4468 = dma.done.wait (%p58_p1), [#allocation12], 1040  }
  0x60   : > { %4470 = vsyncadd (%p58_p1), [#allocation12], 4294966256 }
  0x61   : > { %4472 = dma.done.wait (%p58_p1), [#allocation15], 8192  }
  0x62   : > { %4474 = vsyncadd (%p58_p1), [#allocation15], 4294959104  ;;  %v698_v0 = vld [vmem:[%s4766_s23] sm:$0xff]  ;;  %v699_v1 = vld [vmem:[%s4766_s23 + $0x8] sm:$0xff]  ;;  %v4509_v2 = vmov 128.0   ;;  %s4510_s0 = smov 64  }
  0x63   : > { %702 = vadd.xlane.f32.xlu0 %v698_v0  ;;  %4065 = vrcp.f32 %v4509_v2  ;;  %v3810_v17 = vld [vmem:[#allocation7 + $0x38] sm:$0xff]  ;;  %v3809_v20 = vld [vmem:[#allocation7 + $0x30] sm:$0xff]  ;;  %v3808_v23 = vld [vmem:[#allocation7 + $0x28] sm:$0xff]  ;;  %s4511_s8 = smov 96   ;;  %s4512_s29 = smov 32   ;;  %vm1059_vm7 = vcmask 1047556  }
  0x64   : > { %v3818_v18 = vld [vmem:[#allocation8 + $0x38] sm:$0xff]  ;;  %828 = vmatpush.bf16.msra.mxu0 %v3810_v17  ;;  %v3817_v21 = vld [vmem:[#allocation8 + $0x30] sm:$0xff]  ;;  %v3816_v24 = vld [vmem:[#allocation8 + $0x28] sm:$0xff]  ;;  %vm1747_vm8 = vcmask 261120   ;;  %vm1865_vm10 = vcmask 130048   ;;  %vm2313_vm12 = vcmask 523264  }
  0x65   : > { %v3826_v19 = vld [vmem:[#allocation10 + $0x38] sm:$0xff]  ;;  %912 = vmatpush.bf16.msra.mxu1 %v3818_v18  ;;  %v3825_v22 = vld [vmem:[#allocation10 + $0x30] sm:$0xff]  ;;  %v3824_v25 = vld [vmem:[#allocation10 + $0x28] sm:$0xff]  ;;  %vm2316_vm13 = vcmask 785408   ;;  %s5559_s5 = sld [smem:[#allocation31_spill]]  ;;  %s696_s28 = scalar_lea.vmem [#allocation17], %s3387_s13 }
  0x66   : > { %994 = vmatpush.bf16.msra.mxu2 %v3826_v19  ;;  %v3807_v26 = vld [vmem:[#allocation7 + $0x20] sm:$0xff]  ;;  %v3806_v29 = vld [vmem:[#allocation7 + $0x18] sm:$0xff]  ;;  %v3805_v32 = vld [vmem:[#allocation7 + $0x10] sm:$0xff]  ;;  %s5575_s14 = sld [smem:[#allocation35_spill]]  ;;  %s3220_s3 = sshll.u32 %s696_s28, 4  ;;  %s3221_s3 = int_to_ptr.vmem [resolvable:$true] %s3220_s3 }
  0x67   : > { %v3815_v27 = vld [vmem:[#allocation8 + $0x20] sm:$0xff]  ;;  %v3814_v30 = vld [vmem:[#allocation8 + $0x18] sm:$0xff]  ;;  %v3813_v33 = vld [vmem:[#allocation8 + $0x10] sm:$0xff]  ;;  %s5576_s15 = sld [smem:[#allocation36_spill]] }
  0x68   : > { %829 = vmatpush.bf16.msra.mxu0 %v3809_v20  ;;  %v3823_v28 = vld [vmem:[#allocation10 + $0x20] sm:$0xff]  ;;  %v3822_v31 = vld [vmem:[#allocation10 + $0x18] sm:$0xff]  ;;  %v3821_v34 = vld [vmem:[#allocation10 + $0x10] sm:$0xff] }
  0x69   : > { %v4066_v3 = vpop.eup %4065  ;;  %913 = vmatpush.bf16.msra.mxu1 %v3817_v21  ;;  %v3804_v35 = vld [vmem:[#allocation7 + $0x8] sm:$0xff]  ;;  %v3803_v39 = vld [vmem:[#allocation7] sm:$0xff]  ;;  %v4056_v60 = vld [vmem:[#allocation5] ss:$0 sm:$0xff] }
  0x6a   : > { %v707_v4 = vmul.f32 128.0, %v4066_v3  ;;  %vm711_vm0 = vweird.f32 %v4066_v3  ;;  %995 = vmatpush.bf16.msra.mxu2 %v3825_v22  ;;  %v3812_v36 = vld [vmem:[#allocation8 + $0x8] sm:$0xff]  ;;  %v3811_v40 = vld [vmem:[#allocation8] sm:$0xff] }
  0x6b   : > { %704 = vadd.xlane.f32.xlu0 %v699_v1  ;;  %v3820_v37 = vld [vmem:[#allocation10 + $0x8] sm:$0xff]  ;;  %v3819_v42 = vld [vmem:[#allocation10] sm:$0xff] }
  0x6c   : > { %v708_v5 = vsub.f32 1.0, %v707_v4  ;;  %830 = vmatpush.bf16.msra.mxu0 %v3808_v23 }
  0x6d   : > { %914 = vmatpush.bf16.msra.mxu1 %v3816_v24 }
  0x6e   : > { %v709_v6 = vmul.f32 %v4066_v3, %v708_v5  ;;  %996 = vmatpush.bf16.msra.mxu2 %v3824_v25  ;;  %v4060_v25 = vld [vmem:[#allocation11] ss:$0 sm:$0xff] }
  0x70   : > { %v710_v7 = vadd.f32 %v4066_v3, %v709_v6  ;;  %831 = vmatpush.bf16.msra.mxu0 %v3807_v26  ;;  %v4059_v6 = vld [vmem:[%s5511_s7] ss:$0 sm:$0xff] }
  0x71   : > { %915 = vmatpush.bf16.msra.mxu1 %v3815_v27 }
  0x72   : > { %v4790_v8 = vsel %vm711_vm0, %v4066_v3, %v710_v7  ;;  %997 = vmatpush.bf16.msra.mxu2 %v3823_v28 }
  0x74   : > { %832 = vmatpush.bf16.msra.mxu0 %v3806_v29 }
  0x75   : > { %916 = vmatpush.bf16.msra.mxu1 %v3814_v30 }
  0x76   : > { %998 = vmatpush.bf16.msra.mxu2 %v3822_v31 }
  0x78   : > { %833 = vmatpush.bf16.msra.mxu0 %v3805_v32  ;;  %v4513_v32 = vmov 1983009808  }
  0x79   : > { %917 = vmatpush.bf16.msra.mxu1 %v3813_v33  ;;  %v1050_v33 = vunpack.c.l.s4 %v4513_v32 }
  0x7a   : > { %999 = vmatpush.bf16.msra.mxu2 %v3821_v34 }
  0x7c   : > { %834 = vmatpush.bf16.msra.mxu0 %v3804_v35 }
  0x7d   : > { %918 = vmatpush.bf16.msra.mxu1 %v3812_v36  ;;  %v4852_v36 = vunpack.c.0.s8 %v1050_v33 }
  0x7e   : > { %1000 = vmatpush.bf16.msra.mxu2 %v3820_v37 }
  0x80   : > { %835 = vmatpush.bf16.msra.mxu0 %v3803_v39 }
  0x81   : > { %919 = vmatpush.bf16.msra.mxu1 %v3811_v40  ;;  %v4514_v40 = vmov 1934713408  }
  0x82   : > { %1001 = vmatpush.bf16.msra.mxu2 %v3819_v42 }
  0xd6   : > { %v703_v9 = vpop.xlane.xlu0 %702 }
  0xd7   : > { %v713_v10 = vmul.f32 %v4790_v8, %v703_v9 }
  0xd9   : > { %v4793_v11 = vsub.f32 %v698_v0, %v713_v10 }
  0xdb   : > { %v717_v12 = vmul.f32 %v4793_v11, %v4793_v11 }
  0xdd   : > { %719 = vadd.xlane.f32.xlu1 %v717_v12  ;;  %v4058_v12 = vld [vmem:[%s5510_s6] ss:$0 sm:$0xff] }
  0xde   : > { %v705_v13 = vpop.xlane.xlu0 %704 }
  0xdf   : > { %v714_v14 = vmul.f32 %v4790_v8, %v705_v13 }
  0xe1   : > { %v4798_v15 = vsub.f32 %v699_v1, %v714_v14  ;;  %v4057_v1 = vld [vmem:[%s5506_s2] ss:$0 sm:$0xff] }
  0xe3   : > { %v718_v16 = vmul.f32 %v4798_v15, %v4798_v15 }
  0xe5   : > { %721 = vadd.xlane.f32.xlu1 %v718_v16 }
 0x150   : > { %v720_v38 = vpop.xlane.xlu1 %719 }
 0x151   : > { %v723_v41 = vmul.f32 %v720_v38, %v4790_v8 }
 0x153   : > { %v725_v43 = vadd.f32 1e-05, %v723_v41  ;;  %v1064_v41 = vunpack.c.l.s4 %v4514_v40 }
 0x155   : > { %4067 = vrsqrt.f32 %v725_v43  ;;  %vm733_vm2 = vweird.f32 %v725_v43 }
 0x158   : > { %v722_v44 = vpop.xlane.xlu1 %721 }
 0x159   : > { %v724_v45 = vmul.f32 %v722_v44, %v4790_v8 }
 0x15b   : > { %v4068_v46 = vpop.eup %4067  ;;  %v726_v47 = vadd.f32 1e-05, %v724_v45 }
 0x15c   : > { %v728_v48 = vmul.f32 %v4068_v46, %v725_v43  ;;  %vm734_vm1 = vweird.f32 %v4068_v46 }
 0x15d   : > { %4069 = vrsqrt.f32 %v726_v47  ;;  %vm735_vm3 = vmor %vm733_vm2, %vm734_vm1  ;;  %vm743_vm5 = vweird.f32 %v726_v47 }
 0x15e   : > { %v729_v49 = vmul.f32 %v4068_v46, %v728_v48 }
 0x160   : > { %v730_v50 = vmul.f32 0.5, %v729_v49  ;;  %v4858_v49 = vunpack.c.0.s8 %v1064_v41 }
 0x162   : > { %v731_v51 = vsub.f32 1.5, %v730_v50 }
 0x163   : > { %v4070_v52 = vpop.eup %4069 }
 0x164   : > { %v732_v53 = vmul.f32 %v4068_v46, %v731_v51  ;;  %v738_v54 = vmul.f32 %v4070_v52, %v726_v47  ;;  %vm744_vm4 = vweird.f32 %v4070_v52 }
 0x165   : > { %vm745_vm6 = vmor %vm743_vm5, %vm744_vm4 }
 0x166   : > { %v739_v55 = vmul.f32 %v4070_v52, %v738_v54  ;;  %v736_v56 = vsel %vm735_vm3, %v4068_v46, %v732_v53 }
 0x167   : > { %v747_v59 = vmul.f32 %v736_v56, %v4793_v11 }
 0x168   : > { %v740_v57 = vmul.f32 0.5, %v739_v55 }
 0x169   : > { %v752_v0 = vmul.f32 %v4056_v60, %v747_v59 }
 0x16a   : > { %v741_v58 = vsub.f32 1.5, %v740_v57 }
 0x16b   : > { %v757_v3 = vadd.f32 %v4057_v1, %v752_v0 }
 0x16c   : > { %v742_v61 = vmul.f32 %v4070_v52, %v741_v58 }
 0x16e   : > { %v746_v62 = vsel %vm745_vm6, %v4070_v52, %v742_v61 }
 0x16f   : > { %v748_v63 = vmul.f32 %v746_v62, %v4798_v15 }
 0x171   : > { %v753_v2 = vmul.f32 %v4056_v60, %v748_v63 }
 0x173   : > { %v758_v4 = vadd.f32 %v4057_v1, %v753_v2 }
 0x175   : > { %v759_v5 = vpack.c.bf16 %v758_v4, %v757_v3 }
 0x177   : > { %836 = vmatmul.bf16.vlgmr.msra.gmra.mxu0 %v759_v5  ;;  %920 = vmatmul.bf16.vlgmr.msra.gmra.mxu1 %v759_v5 }
 0x178   : > { %1002 = vmatmul.bf16.vlgmr.msra.gmra.mxu2 %v759_v5 }
 0x1f4   : > { %v837_v7 = vpop.f32.mrf.mxu0  ;;  %v921_v9 = vpop.f32.mrf.mxu1 }
 0x1f5   : > { %v922_v10 = vadd.f32 %v4059_v6, %v921_v9  ;;  %v838_v18 = vadd.f32 %v4058_v12, %v837_v7 }
 0x1f7   : > { %v1253_v11 = vpack.c.bf16 %v922_v10, %v922_v10  ;;  %v842_v22 = vmul.f32 0.17677669, %v838_v18 }
 0x1f9   : > { %1261 = vrot.lane.b32.xlu0 %v1253_v11, %s4510_s0  ;;  %1257 = vrot.lane.b32.xlu2 %v1253_v11, %s4511_s8  ;;  %v4826_v23 = vpack.c.bf16 %v842_v22, %v842_v22  ;;  %v1272_v38 = vshrl.u32 %v1253_v11, 16 }
 0x1fb   : > { %v1003_v17 = vpop.f32.mrf.mxu2  ;;  %v1027_v5 = vshrl.u32 %v4826_v23, 16 }
 0x1fc   : > { %v839_v13 = vpop.f32.mrf.mxu0  ;;  %v923_v14 = vpop.f32.mrf.mxu1  ;;  %v1004_v27 = vadd.f32 %v4060_v25, %v1003_v17 }
 0x1fd   : > { %v840_v15 = vadd.f32 %v4058_v12, %v839_v13  ;;  %v924_v16 = vadd.f32 %v4059_v6, %v923_v14 }
 0x1fe   : > { %v4836_v29 = vpack.c.bf16 %v1004_v27, %v1004_v27 }
 0x1ff   : > { %v843_v19 = vmul.f32 0.17677669, %v840_v15  ;;  %v4817_v20 = vpack.c.bf16 %v924_v16, %v924_v16 }
 0x201   : > { %v4819_v21 = vpack.c.bf16 %v843_v19, %v843_v19  ;;  %1263 = vrot.lane.b32.xlu1 %v4817_v20, %s4510_s0  ;;  %1265 = vrot.lane.b32.xlu2 %v1253_v11, %s4512_s29  ;;  %v1284_v9 = vshrl.u32 %v4817_v20, 16 }
 0x203   : > { %1014 = vrot.lane.b32.xlu0 %v4819_v21, %s4511_s8  ;;  %v1005_v24 = vpop.f32.mrf.mxu2 }
 0x204   : > { %v1006_v26 = vadd.f32 %v4060_v25, %v1005_v24  ;;  %v1039_v24 = vshrl.u32 %v4819_v21, 16 }
 0x206   : > { %v4834_v28 = vpack.c.bf16 %v1006_v26, %v1006_v26 }
 0x209   : > { %1018 = vrot.lane.b32.xlu1 %v4819_v21, %s4510_s0  ;;  %1012 = vrot.lane.b32.xlu2 %v4826_v23, %s4511_s8 }
 0x20b   : > { %1020 = vrot.lane.b32.xlu0 %v4826_v23, %s4512_s29 }
 0x211   : > { %1503 = vrot.lane.b32.xlu1 %v4834_v28, %s4511_s8  ;;  %1016 = vrot.lane.b32.xlu2 %v4826_v23, %s4510_s0 }
 0x213   : > { %1505 = vrot.lane.b32.xlu0 %v4836_v29, %s4510_s0 }
 0x219   : > { %1259 = vrot.lane.b32.xlu2 %v4817_v20, %s4511_s8 }
 0x221   : > { %1267 = vrot.lane.b32.xlu2 %v4817_v20, %s4512_s29 }
 0x229   : > { %1022 = vrot.lane.b32.xlu2 %v4819_v21, %s4512_s29 }
 0x231   : > { %1501 = vrot.lane.b32.xlu2 %v4836_v29, %s4511_s8 }
 0x253   : > { %v1258_v30 = vpop.permute.xlu2 %1257 }
 0x254   : > { %v1273_v35 = vshrl.u32 %v1258_v30, 16  ;;  %v1271_v37 = vpack.i.b16 %v1258_v30, %v1253_v11 }
 0x256   : > { %v1274_v39 = vpack.i.b16 %v1273_v35, %v1272_v38  ;;  %v1297_v42 = vperm.slane %v1271_v37, %v4852_v36 }
 0x258   : > { %v1323_v45 = vperm.slane %v1274_v39, %v4852_v36  ;;  %v1305_v50 = vrot.slane %v1297_v42, 4 }
 0x25a   : > { %v1331_v53 = vrot.slane %v1323_v45, 4 }
 0x25b   : > { %v1266_v31 = vpop.permute.xlu2 %1265 }
 0x25c   : > { %v1279_v46 = vshrl.u32 %v1266_v31, 16 }
 0x263   : > { %v1013_v34 = vpop.permute.xlu2 %1012 }
 0x264   : > { %v1026_v58 = vpack.i.b16 %v1013_v34, %v4826_v23  ;;  %v1028_v62 = vshrl.u32 %v1013_v34, 16 }
 0x266   : > { %v1029_v13 = vpack.i.b16 %v1028_v62, %v1027_v5  ;;  %v1052_v14 = vperm.slane %v1026_v58, %v4852_v36 }
 0x268   : > { %v1061_v25 = vrot.slane %v1052_v14, 4  ;;  %v1079_v26 = vperm.slane %v1029_v13, %v4852_v36 }
 0x26a   : > { %v1087_v5 = vrot.slane %v1079_v26, 4 }
 0x26b   : > { %v1262_v43 = vpop.permute.xlu0 %1261  ;;  %v4855_v44 = vpop.permute.xlu2 %1016 }
 0x26c   : > { %v1277_v47 = vpack.i.b16 %v1266_v31, %v1262_v43  ;;  %v1278_v48 = vshrl.u32 %v1262_v43, 16  ;;  %v1033_v37 = vshrl.u32 %v4855_v44, 16 }
 0x26e   : > { %v1280_v51 = vpack.i.b16 %v1279_v46, %v1278_v48  ;;  %v1302_v52 = vperm.slane %v1277_v47, %v4852_v36 }
 0x270   : > { %v1303_v54 = vrot.slane %v1302_v52, 4  ;;  %v1306_v55 = vsel %vm1059_vm7, %v1302_v52, %v1305_v50  ;;  %v1328_v56 = vperm.slane %v1280_v51, %v4852_v36 }
 0x271   : > { %v1314_v57 = vperm.slane %v1306_v55, %v4858_v49 }
 0x272   : > { %v1304_v59 = vsel %vm1059_vm7, %v1303_v54, %v1297_v42  ;;  %v1329_v60 = vrot.slane %v1328_v56, 4  ;;  %v1332_v61 = vsel %vm1059_vm7, %v1328_v56, %v1331_v53 }
 0x273   : > { %v1310_v63 = vperm.slane %v1304_v59, %v4858_v49  ;;  %v1317_v0 = vrot.slane %v1314_v57, 4  ;;  %v1340_v1 = vperm.slane %v1332_v61, %v4858_v49  ;;  %v1260_v2 = vpop.permute.xlu2 %1259  ;;  %v1264_v19 = vpop.permute.xlu1 %1263 }
 0x274   : > { %v1330_v3 = vsel %vm1059_vm7, %v1329_v60, %v1323_v45  ;;  %v1285_v4 = vshrl.u32 %v1260_v2, 16  ;;  %v1283_v12 = vpack.i.b16 %v1260_v2, %v4817_v20  ;;  %v1290_v31 = vshrl.u32 %v1264_v19, 16 }
 0x275   : > { %v1315_v6 = vrot.slane %v1310_v63, 4  ;;  %v1318_v7 = vsel %vm1059_vm7, 0, %v1317_v0  ;;  %v1015_v10 = vpop.permute.xlu0 %1014  ;;  %v1343_v11 = vrot.slane %v1340_v1, 4  ;;  %v1336_v15 = vperm.slane %v1330_v3, %v4858_v49 }
 0x276   : > { %v1286_v16 = vpack.i.b16 %v1285_v4, %v1284_v9  ;;  %v1402_v17 = vrot.slane %v1318_v7, 4  ;;  %v1349_v23 = vperm.slane %v1283_v12, %v4852_v36  ;;  %v1038_v38 = vpack.i.b16 %v1015_v10, %v4819_v21 }
 0x277   : > { %v1316_v18 = vsel %vm1059_vm7, 0, %v1315_v6  ;;  %v1344_v22 = vsel %vm1059_vm7, 0, %v1343_v11  ;;  %v1341_v20 = vrot.slane %v1336_v15, 4  ;;  %v1040_v39 = vshrl.u32 %v1015_v10, 16 }
 0x278   : > { %v1375_v27 = vperm.slane %v1286_v16, %v4852_v36  ;;  %v1403_v34 = vsel %vm1059_vm7, %v1402_v17, %v1316_v18  ;;  %v1421_v35 = vrot.slane %v1344_v22, 4  ;;  %v1357_v41 = vrot.slane %v1349_v23, 4 }
 0x279   : > { %v1342_v46 = vsel %vm1059_vm7, 0, %v1341_v20  ;;  %v1407_v50 = vperm.slane %v1403_v34, %v4852_v36  ;;  %v1397_v54 = vsel %vm1059_vm7, %v1317_v0, %v1310_v63  ;;  %v1041_v55 = vpack.i.b16 %v1040_v39, %v1039_v24 }
 0x27a   : > { %v1383_v47 = vrot.slane %v1375_v27, 4  ;;  %v4894_v56 = vperm.slane %v1038_v38, %v4852_v36  ;;  %v1422_v60 = vsel %vm1059_vm7, %v1421_v35, %v1342_v46  ;;  %v1401_v6 = vperm.slane %v1397_v54, %v4852_v36 }
 0x27b   : > { %v1268_v30 = vpop.permute.xlu2 %1267  ;;  %v1408_v2 = vrot.slane %v1407_v50, 4  ;;  %v1426_v7 = vperm.slane %v1422_v60, %v4852_v36  ;;  %v1416_v13 = vsel %vm1059_vm7, %v1343_v11, %v1336_v15  ;;  %v1019_v17 = vpop.permute.xlu1 %1018 }
 0x27c   : > { %v1289_v32 = vpack.i.b16 %v1268_v30, %v1264_v19  ;;  %v1291_v33 = vshrl.u32 %v1268_v30, 16  ;;  %v1113_v16 = vrot.slane %v4894_v56, 4  ;;  %v1420_v15 = vperm.slane %v1416_v13, %v4852_v36 }
 0x27d   : > { %v1021_v40 = vpop.permute.xlu0 %1020  ;;  %v1409_v20 = vsel %vm1059_vm7, %v1408_v2, %v1401_v6  ;;  %v1427_v30 = vrot.slane %v1426_v7, 4 }
 0x27e   : > { %v1292_v42 = vpack.i.b16 %v1291_v33, %v1290_v31  ;;  %v1354_v43 = vperm.slane %v1289_v32, %v4852_v36  ;;  %v1032_v45 = vpack.i.b16 %v1021_v40, %v4855_v44  ;;  %v1034_v48 = vshrl.u32 %v1021_v40, 16 }
 0x27f   : > { %v1045_v31 = vshrl.u32 %v1019_v17, 16  ;;  %v4923_v39 = vperm.slane %v1409_v20, %v4858_v49 }
 0x280   : > { %v1355_v51 = vrot.slane %v1354_v43, 4  ;;  %v1358_v52 = vsel %vm1059_vm7, %v1354_v43, %v1357_v41  ;;  %v1380_v53 = vperm.slane %v1292_v42, %v4852_v36  ;;  %v1057_v21 = vperm.slane %v1032_v45, %v4852_v36 }
 0x281   : > { %v1035_v44 = vpack.i.b16 %v1034_v48, %v1033_v37  ;;  %v1366_v62 = vperm.slane %v1358_v52, %v4858_v49 }
 0x282   : > { %v1381_v57 = vrot.slane %v1380_v53, 4  ;;  %v1384_v58 = vsel %vm1059_vm7, %v1380_v53, %v1383_v47  ;;  %v1058_v59 = vrot.slane %v1057_v21, 4  ;;  %v1356_v61 = vsel %vm1059_vm7, %v1355_v51, %v1349_v23 }
 0x283   : > { %v1062_v1 = vsel %vm1059_vm7, %v1057_v21, %v1061_v25  ;;  %v1392_v63 = vperm.slane %v1384_v58, %v4858_v49  ;;  %v1084_v4 = vperm.slane %v1035_v44, %v4852_v36  ;;  %v1362_v18 = vperm.slane %v1356_v61, %v4858_v49  ;;  %v1023_v25 = vpop.permute.xlu2 %1022 }
 0x284   : > { %v1060_v0 = vsel %vm1059_vm7, %v1058_v59, %v1052_v14  ;;  %v1070_v3 = vperm.slane %v1062_v1, %v4858_v49  ;;  %v1382_v9 = vsel %vm1059_vm7, %v1381_v57, %v1375_v27  ;;  %v1131_v14 = vperm.slane %v1041_v55, %v4852_v36 }
 0x285   : > { %v1066_v10 = vperm.slane %v1060_v0, %v4858_v49  ;;  %v1085_v19 = vrot.slane %v1084_v4, 4  ;;  %v1369_v22 = vrot.slane %v1366_v62, 4  ;;  %v4913_v23 = vrot.slane %v1392_v63, 4 }
 0x286   : > { %v1073_v12 = vrot.slane %v1070_v3, 4  ;;  %v1088_v24 = vsel %vm1059_vm7, %v1084_v4, %v1087_v5  ;;  %v1388_v27 = vperm.slane %v1382_v9, %v4858_v49  ;;  %v1139_v35 = vrot.slane %v1131_v14, 4 }
 0x287   : > { %v1086_v11 = vsel %vm1059_vm7, %v1085_v19, %v1079_v26  ;;  %v1071_v32 = vrot.slane %v1066_v10, 4  ;;  %v1096_v34 = vperm.slane %v1088_v24, %v4858_v49  ;;  %v1367_v37 = vrot.slane %v1362_v18, 4 }
 0x288   : > { %v1074_v33 = vsel %vm1059_vm7, 0, %v1073_v12  ;;  %v1044_v38 = vpack.i.b16 %v1023_v25, %v1019_v17  ;;  %v1370_v40 = vsel %vm1059_vm7, 0, %v1369_v22  ;;  %v1396_v26 = vsel %vm1059_vm7, 0, %v4913_v23 }
 0x289   : > { %v1092_v41 = vperm.slane %v1086_v11, %v4858_v49  ;;  %v1046_v42 = vshrl.u32 %v1023_v25, 16  ;;  %v1393_v43 = vrot.slane %v1388_v27, 4  ;;  %v4930_v45 = vsel %vm1059_vm7, %v1073_v12, %v1066_v10 }
 0x28a   : > { %v1158_v46 = vrot.slane %v1074_v33, 4  ;;  %v1428_v47 = vsel %vm1059_vm7, %v1427_v30, %v1420_v15  ;;  %v1072_v48 = vsel %vm1059_vm7, 0, %v1071_v32  ;;  %v1099_v50 = vrot.slane %v1096_v34, 4 }
 0x28b   : > { %v1047_v51 = vpack.i.b16 %v1046_v42, %v1045_v31  ;;  %v1110_v52 = vperm.slane %v1044_v38, %v4852_v36  ;;  %v1368_v53 = vsel %vm1059_vm7, 0, %v1367_v37  ;;  %v1435_v21 = vsel %vm1059_vm7, %v1369_v22, %v1362_v18 }
 0x28c   : > { %v1440_v54 = vrot.slane %v1370_v40, 4  ;;  %v1459_v55 = vrot.slane %v1396_v26, 4  ;;  %v1097_v44 = vrot.slane %v1092_v41, 4  ;;  %v1394_v60 = vsel %vm1059_vm7, 0, %v1393_v43 }
 0x28d   : > { %v1111_v57 = vrot.slane %v1110_v52, 4  ;;  %v1114_v58 = vsel %vm1059_vm7, %v1110_v52, %v1113_v16  ;;  %v1136_v59 = vperm.slane %v1047_v51, %v4852_v36  ;;  %v1157_v61 = vperm.slane %v4930_v45, %v4852_v36 }
 0x28e   : > { %v1159_v62 = vsel %vm1059_vm7, %v1158_v46, %v1072_v48  ;;  %v1122_v1 = vperm.slane %v1114_v58, %v4858_v49  ;;  %v1100_v2 = vsel %vm1059_vm7, 0, %v1099_v50  ;;  %v4949_v4 = vsel %vm1059_vm7, %v1099_v50, %v1092_v41 }
 0x28f   : > { %v1112_v63 = vsel %vm1059_vm7, %v1111_v57, %v4894_v56  ;;  %v1137_v0 = vrot.slane %v1136_v59, 4  ;;  %v1140_v3 = vsel %vm1059_vm7, %v1136_v59, %v1139_v35  ;;  %v1098_v9 = vsel %vm1059_vm7, 0, %v1097_v44 }
 0x290   : > { %v1118_v5 = vperm.slane %v1112_v63, %v4858_v49  ;;  %v1125_v6 = vrot.slane %v1122_v1, 4  ;;  %v1148_v7 = vperm.slane %v1140_v3, %v4858_v49  ;;  %v1432_v12 = vperm.slane %v1428_v47, %v4858_v49 }
 0x291   : > { %v1138_v10 = vsel %vm1059_vm7, %v1137_v0, %v1131_v14  ;;  %v1441_v13 = vsel %vm1059_vm7, %v1440_v54, %v1368_v53  ;;  %v1177_v19 = vrot.slane %v1100_v2, 4  ;;  %v1454_v15 = vsel %vm1059_vm7, %v4913_v23, %v1388_v27 }
 0x292   : > { %v1123_v56 = vrot.slane %v1118_v5, 4  ;;  %v1126_v16 = vsel %vm1059_vm7, 0, %v1125_v6  ;;  %v1144_v17 = vperm.slane %v1138_v10, %v4858_v49  ;;  %v1151_v18 = vrot.slane %v1148_v7, 4 }
 0x293   : > { %v1191_v22 = vsel %vm1059_vm7, %v1125_v6, %v1118_v5  ;;  %v1196_v24 = vrot.slane %v1126_v16, 4  ;;  %v1445_v25 = vperm.slane %v1441_v13, %v4852_v36  ;;  %v1439_v32 = vperm.slane %v1435_v21, %v4852_v36 }
 0x294   : > { %v1124_v20 = vsel %vm1059_vm7, 0, %v1123_v56  ;;  %v1149_v11 = vrot.slane %v1144_v17, 4  ;;  %v1152_v14 = vsel %vm1059_vm7, 0, %v1151_v18  ;;  %v1195_v30 = vperm.slane %v1191_v22, %v4852_v36 }
 0x295   : > { %v1197_v31 = vsel %vm1059_vm7, %v1196_v24, %v1124_v20  ;;  %v1446_v33 = vrot.slane %v1445_v25, 4  ;;  %v4969_v34 = vsel %vm1059_vm7, %v1151_v18, %v1144_v17  ;;  %v1215_v35 = vrot.slane %v1152_v14, 4 }
 0x296   : > { %v1460_v37 = vsel %vm1059_vm7, %v1459_v55, %v1394_v60  ;;  %v1475_v38 = vpack.i.b16 %v1432_v12, %v4923_v39  ;;  %v1150_v40 = vsel %vm1059_vm7, 0, %v1149_v11  ;;  %v1458_v23 = vperm.slane %v1454_v15, %v4852_v36 }
 0x297   : > { %v1447_v26 = vsel %vm1059_vm7, %v1446_v33, %v1439_v32  ;;  %v1464_v27 = vperm.slane %v1460_v37, %v4852_v36  ;;  %v1476_v42 = vshrl.u32 %v4923_v39, 16  ;;  %v1477_v43 = vshrl.u32 %v1432_v12, 16 }
 0x298   : > { %v1451_v41 = vperm.slane %v1447_v26, %v4858_v49  ;;  %v1414_v45 = vrot.slane %v4923_v39, 4  ;;  %v1433_v47 = vrot.slane %v1432_v12, 4  ;;  %v1163_v48 = vperm.slane %v1159_v62, %v4852_v36 }
 0x299   : > { %v1465_v46 = vrot.slane %v1464_v27, 4  ;;  %v1744_v50 = vunpack.c.l.b16 %v1475_v38  ;;  %v1478_v51 = vpack.i.b16 %v1477_v43, %v1476_v42  ;;  %v1176_v44 = vperm.slane %v4949_v4, %v4852_v36 }
 0x29a   : > { %v1415_v52 = vsel %vm1059_vm7, 0, %v1414_v45  ;;  %v1452_v53 = vrot.slane %v1451_v41, 4  ;;  %v1434_v54 = vsel %vm1059_vm7, 0, %v1433_v47  ;;  %v1164_v55 = vrot.slane %v1163_v48, 4 }
 0x29b   : > { %v1466_v21 = vsel %vm1059_vm7, %v1465_v46, %v1458_v23  ;;  %v1488_v57 = vshrl.u32 %v1451_v41, 16  ;;  %v1483_v59 = vshrl.u32 %v1434_v54, 16  ;;  %v1482_v60 = vshrl.u32 %v1415_v52, 16 }
 0x29c   : > { %v1470_v39 = vperm.slane %v1466_v21, %v4858_v49  ;;  %v1453_v58 = vsel %vm1059_vm7, 0, %v1452_v53  ;;  %v1165_v62 = vsel %vm1059_vm7, %v1164_v55, %v1157_v61  ;;  %v1178_v1 = vsel %vm1059_vm7, %v1177_v19, %v1098_v9 }
 0x29d   : > { %v1201_v2 = vperm.slane %v1197_v31, %v4852_v36  ;;  %v1771_v3 = vunpack.c.l.b16 %v1478_v51  ;;  %v1484_v6 = vpack.i.b16 %v1483_v59, %v1482_v60  ;;  %v1494_v7 = vshrl.u32 %v1453_v58, 16 }
 0x29e   : > { %v1487_v63 = vpack.i.b16 %v1470_v39, %v1451_v41  ;;  %v1489_v0 = vshrl.u32 %v1470_v39, 16  ;;  %v1471_v5 = vrot.slane %v1470_v39, 4  ;;  %v1182_v4 = vperm.slane %v1178_v1, %v4852_v36 }
 0x29f   : > { %v1202_v10 = vrot.slane %v1201_v2, 4  ;;  %v4994_v16 = vperm.slane %v1165_v62, %v4858_v49  ;;  %v1216_v18 = vsel %vm1059_vm7, %v1215_v35, %v1150_v40  ;;  %v1214_v24 = vperm.slane %v4969_v34, %v4852_v36 }
 0x2a0   : > { %v1745_v12 = vunpack.c.l.b16 %v1487_v63  ;;  %v1490_v13 = vpack.i.b16 %v1489_v0, %v1488_v57  ;;  %v1472_v56 = vsel %vm1059_vm7, 0, %v1471_v5  ;;  %v1183_v9 = vrot.slane %v1182_v4, 4 }
 0x2a1   : > { %v1495_v61 = vshrl.u32 %v1472_v56, 16  ;;  %v1203_v17 = vsel %vm1059_vm7, %v1202_v10, %v1195_v30  ;;  %v1220_v25 = vperm.slane %v1216_v18, %v4852_v36  ;;  %v1493_v15 = vpack.i.b16 %v1472_v56, %v1453_v58 }
 0x2a2   : > { %v1746_v19 = vpack.c.b16 %v1745_v12, %v1744_v50  ;;  %v1772_v22 = vunpack.c.l.b16 %v1490_v13  ;;  %v1184_v11 = vsel %vm1059_vm7, %v1183_v9, %v1176_v44  ;;  %v1207_v14 = vperm.slane %v1203_v17, %v4858_v49 }
 0x2a3   : > { %v1496_v20 = vpack.i.b16 %v1495_v61, %v1494_v7  ;;  %v1188_v30 = vperm.slane %v1184_v11, %v4858_v49  ;;  %v1221_v33 = vrot.slane %v1220_v25, 4  ;;  %v1823_v35 = vunpack.c.l.b16 %v1484_v6 }
 0x2a4   : > { %v1752_v31 = vsel %vm1747_vm8, %v1746_v19, 0  ;;  %v1773_v32 = vpack.c.b16 %v1772_v22, %v1771_v3  ;;  %v1481_v38 = vpack.i.b16 %v1434_v54, %v1415_v52  ;;  %v1170_v34 = vrot.slane %v4994_v16, 4 }
 0x2a5   : > { %1761 = vmatpush.bf16.xpose.msra.mxu3 %v1752_v31  ;;  %v1824_v37 = vunpack.c.l.b16 %v1496_v20  ;;  %v1222_v26 = vsel %vm1059_vm7, %v1221_v33, %v1214_v24  ;;  %v1798_v23 = vunpack.c.l.b16 %v1493_v15  ;;  %v1189_v27 = vrot.slane %v1188_v30, 4 }
 0x2a6   : > { %v1778_v40 = vsel %vm1747_vm8, %v1773_v32, 0  ;;  %v1226_v42 = vperm.slane %v1222_v26, %v4858_v49  ;;  %v1231_v43 = vpack.i.b16 %v1188_v30, %v4994_v16  ;;  %v1171_v45 = vsel %vm1059_vm7, 0, %v1170_v34 }
 0x2a7   : > { %v1825_v41 = vpack.c.b16 %v1824_v37, %v1823_v35  ;;  %v1190_v46 = vsel %vm1059_vm7, 0, %v1189_v27  ;;  %v1208_v47 = vrot.slane %v1207_v14, 4  ;;  %v1797_v51 = vunpack.c.l.b16 %v1481_v38 }
 0x2a8   : > { %v1243_v50 = vpack.i.b16 %v1226_v42, %v1207_v14  ;;  %v1227_v52 = vrot.slane %v1226_v42, 4  ;;  %v1238_v21 = vshrl.u32 %v1171_v45, 16  ;;  %v1239_v54 = vshrl.u32 %v1190_v46, 16 }
 0x2a9   : > { %v1830_v48 = vsel %vm1747_vm8, %v1825_v41, 0  ;;  %v1209_v53 = vsel %vm1059_vm7, 0, %v1208_v47  ;;  %v1741_v55 = vunpack.c.l.b16 %v1231_v43  ;;  %v1799_v39 = vpack.c.b16 %v1798_v23, %v1797_v51 }
 0x2aa   : > { %1839 = vmatpush.bf16.xpose.msrb.mxu0 %v1830_v48  ;;  %v1742_v44 = vunpack.c.l.b16 %v1243_v50  ;;  %v1228_v57 = vsel %vm1059_vm7, 0, %v1227_v52  ;;  %v1240_v58 = vpack.i.b16 %v1239_v54, %v1238_v21  ;;  %v1250_v59 = vshrl.u32 %v1209_v53, 16  ;;  %v5046_v52 = vpop.permute.xlu1 %1503 }
 0x2ab   : > { %v1251_v60 = vshrl.u32 %v1228_v57, 16  ;;  %v1804_v2 = vsel %vm1747_vm8, %v1799_v39, 0  ;;  %v1245_v3 = vshrl.u32 %v1226_v42, 16  ;;  %v1233_v6 = vshrl.u32 %v1188_v30, 16 }
 0x2ac   : > { %v1743_v62 = vpack.c.b16 %v1742_v44, %v1741_v55  ;;  %v1820_v63 = vunpack.c.l.b16 %v1240_v58  ;;  %v1244_v7 = vshrl.u32 %v1207_v14, 16  ;;  %v1232_v4 = vshrl.u32 %v4994_v16, 16  ;;  %v1502_v58 = vpop.permute.xlu2 %1501 }
 0x2ad   : > { %1787 = vmatpush.bf16.xpose.msrb.mxu3 %v1778_v40  ;;  %v1252_v1 = vpack.i.b16 %v1251_v60, %v1250_v59  ;;  %v1249_v9 = vpack.i.b16 %v1228_v57, %v1209_v53  ;;  %v1237_v17 = vpack.i.b16 %v1190_v46, %v1171_v45  ;;  %v1846_v24 = vlaneseq  ;;  %v1506_v53 = vpop.permute.xlu0 %1505 }
 0x2ae   : > { %3493 = vmatmul.msk.bf16.vlgmr.msra.gmra.mxu3 %vm1747_vm8, %v1743_v62  ;;  %v1246_v10 = vpack.i.b16 %v1245_v3, %v1244_v7  ;;  %v1234_v12 = vpack.i.b16 %v1233_v6, %v1232_v4 }
 0x2af   : > { %v1821_v0 = vunpack.c.l.b16 %v1252_v1  ;;  %v1795_v18 = vunpack.c.l.b16 %v1249_v9  ;;  %v1794_v19 = vunpack.c.l.b16 %v1237_v17  ;;  %v1847_v25 = vshrl.u32 %v1846_v24, 7 }
 0x2b0   : > { %v1769_v13 = vunpack.c.l.b16 %v1246_v10  ;;  %v1768_v56 = vunpack.c.l.b16 %v1234_v12  ;;  %v1850_v20 = vand.u32 127, %v1846_v24 }
 0x2b1   : > { %v1822_v5 = vpack.c.b16 %v1821_v0, %v1820_v63  ;;  %v1796_v22 = vpack.c.b16 %v1795_v18, %v1794_v19  ;;  %v1848_v31 = vadd.s32 8, %v1847_v25  ;;  %v1516_v18 = vshrl.u32 %v4836_v29, 16 }
 0x2b2   : > { %v1770_v61 = vpack.c.b16 %v1769_v13, %v1768_v56  ;;  %vm1851_vm9 = vcmp.gt.s32.totalorder %v1850_v20, %v1847_v25  ;;  %v1517_v56 = vshrl.u32 %v1502_v58, 16  ;;  %v1515_v19 = vpack.i.b16 %v1502_v58, %v4836_v29 }
 0x2b3   : > { %3496 = vmatmul.msk.bf16.vlgmr.msrb.gmra.mxu0 %vm1747_vm8, %v1822_v5  ;;  %vm1852_vm11 = vcmp.gt.s32.totalorder %v1850_v20, %v1848_v31 }
 0x2b5   : > { %1813 = vmatpush.bf16.xpose.msra.mxu3 %v1804_v2 }
 0x2be   : > { %3494 = vmatmul.msk.bf16.vlgmr.msrb.gmra.mxu3 %vm1747_vm8, %v1770_v61 }
 0x2ce   : > { %3495 = vmatmul.msk.bf16.vlgmr.msra.gmra.mxu3 %vm1747_vm8, %v1796_v22  ;;  %v1518_v22 = vpack.i.b16 %v1517_v56, %v1516_v18 }
 0x2d0   : > { %v1567_v31 = vperm.slane %v1518_v22, %v4852_v36 }
 0x330   : > { %v1841_v16 = vpop.f32.mrf.mxu0 }
 0x331   : > { %v5022_v11 = vsel %vm1851_vm9, -1e+30, %v1841_v16  ;;  %v1763_v14 = vpop.f32.mrf.mxu3  ;;  %v1541_v16 = vperm.slane %v1515_v19, %v4852_v36 }
 0x332   : > { %v1884_v15 = vsel %vm1865_vm10, %v5022_v11, -inf  ;;  %v1857_v32 = vsel %vm1851_vm9, -1e+30, %v1763_v14 }
 0x333   : > { %1885 = vmax.xlane.f32.xlu1 %v1884_v15  ;;  %v1866_v37 = vsel %vm1865_vm10, %v1857_v32, -inf  ;;  %v1522_v15 = vshrl.u32 %v1506_v53, 16 }
 0x338   : > { %v1843_v30 = vpop.f32.mrf.mxu0 }
 0x339   : > { %v1864_v33 = vsel %vm1852_vm11, -1e+30, %v1843_v30  ;;  %v1765_v35 = vpop.f32.mrf.mxu3 }
 0x33a   : > { %v1887_v38 = vsel %vm1865_vm10, %v1864_v33, -inf  ;;  %v1858_v34 = vsel %vm1852_vm11, -1e+30, %v1765_v35 }
 0x33b   : > { %1867 = vmax.xlane.f32.xlu1 %v1866_v37  ;;  %1888 = vmax.xlane.f32.xlu0 %v1887_v38  ;;  %v1869_v26 = vsel %vm1865_vm10, %v1858_v34, -inf }
 0x341   : > { %v1789_v40 = vpop.f32.mrf.mxu3 }
 0x342   : > { %v1859_v23 = vsel %vm1851_vm9, -1e+30, %v1789_v40  ;;  %v1549_v40 = vrot.slane %v1541_v16, 4 }
 0x343   : > { %1870 = vmax.xlane.f32.xlu0 %v1869_v26  ;;  %v1872_v42 = vsel %vm1865_vm10, %v1859_v23, -inf }
 0x349   : > { %v1791_v27 = vpop.f32.mrf.mxu3 }
 0x34a   : > { %v1860_v41 = vsel %vm1852_vm11, -1e+30, %v1791_v27  ;;  %v1575_v27 = vrot.slane %v1567_v31, 4 }
 0x34b   : > { %1873 = vmax.xlane.f32.xlu0 %v1872_v42  ;;  %v1875_v43 = vsel %vm1865_vm10, %v1860_v41, -inf }
 0x34c   : > { %1876 = vmax.xlane.f32.xlu2 %v1875_v43 }
 0x351   : > { %v1815_v45 = vpop.f32.mrf.mxu3 }
 0x352   : > { %v1861_v46 = vsel %vm1851_vm9, -1e+30, %v1815_v45 }
 0x353   : > { %v1878_v47 = vsel %vm1865_vm10, %v1861_v46, -inf }
 0x354   : > { %1879 = vmax.xlane.f32.xlu2 %v1878_v47 }
 0x359   : > { %v1817_v48 = vpop.f32.mrf.mxu3 }
 0x35a   : > { %v1862_v50 = vsel %vm1852_vm11, -1e+30, %v1817_v48 }
 0x35b   : > { %v1881_v51 = vsel %vm1865_vm10, %v1862_v50, -inf }
 0x35c   : > { %1882 = vmax.xlane.f32.xlu1 %v1881_v51 }
 0x35f   : > { %1509 = vrot.lane.b32.xlu0 %v4836_v29, %s4512_s29 }
 0x36c   : > { %1507 = vrot.lane.b32.xlu2 %v4834_v28, %s4510_s0 }
 0x375   : > { %1511 = vrot.lane.b32.xlu1 %v4834_v28, %s4512_s29 }
 0x3a6   : > { %v5048_v21 = vpop.xlane.xlu1 %1885 }
 0x3a7   : > { %v1896_v38 = vsub.f32 %v5022_v11, %v5048_v21 }
 0x3a9   : > { %v1910_v45 = vmul.f32 1.442695, %v1896_v38 }
 0x3ae   : > { %v1868_v54 = vpop.xlane.xlu1 %1867  ;;  %v1889_v55 = vpop.xlane.xlu0 %1888 }
 0x3af   : > { %v1890_v44 = vsub.f32 %v1857_v32, %v1868_v54  ;;  %v1897_v3 = vsub.f32 %v1864_v33, %v1889_v55 }
 0x3b1   : > { %v1898_v39 = vmul.f32 1.442695, %v1890_v44  ;;  %v1912_v4 = vmul.f32 1.442695, %v1897_v3 }
 0x3b3   : > { %4071 = vpow2.f32 %v1898_v39 }
 0x3b6   : > { %v1871_v57 = vpop.xlane.xlu0 %1870 }
 0x3b7   : > { %v1891_v59 = vsub.f32 %v1858_v34, %v1871_v57 }
 0x3b9   : > { %v5050_v60 = vpop.eup %4071  ;;  %v1900_v62 = vmul.f32 1.442695, %v1891_v59 }
 0x3ba   : > { %v1914_v1 = vsel %vm1865_vm10, %v5050_v60, 0.0 }
 0x3bb   : > { %4073 = vpow2.f32 %v1900_v62  ;;  %1915 = vadd.xlane.f32.xlu2 %v1914_v1 }
 0x3be   : > { %v1874_v2 = vpop.xlane.xlu0 %1873 }
 0x3bf   : > { %v1892_v63 = vsub.f32 %v1859_v23, %v1874_v2  ;;  %v1877_v0 = vpop.xlane.xlu2 %1876 }
 0x3c0   : > { %v1893_v61 = vsub.f32 %v1860_v41, %v1877_v0 }
 0x3c1   : > { %v5054_v5 = vpop.eup %4073  ;;  %v1902_v6 = vmul.f32 1.442695, %v1892_v63  ;;  %v1529_v63 = vshrl.u32 %v5046_v52, 16 }
 0x3c2   : > { %v1917_v7 = vsel %vm1865_vm10, %v5054_v5, 0.0  ;;  %v1904_v25 = vmul.f32 1.442695, %v1893_v61 }
 0x3c3   : > { %4075 = vpow2.f32 %v1902_v6  ;;  %1918 = vadd.xlane.f32.xlu0 %v1917_v7  ;;  %v1528_v6 = vshrl.u32 %v4834_v28, 16 }
 0x3c4   : > { %4077 = vpow2.f32 %v1912_v4 }
 0x3c5   : > { %v1530_v56 = vpack.i.b16 %v1529_v63, %v1528_v6 }
 0x3c7   : > { %v1880_v10 = vpop.xlane.xlu2 %1879  ;;  %v1619_v22 = vperm.slane %v1530_v56, %v4852_v36 }
 0x3c8   : > { %v1894_v12 = vsub.f32 %v1861_v46, %v1880_v10  ;;  %v1527_v10 = vpack.i.b16 %v5046_v52, %v4834_v28 }
 0x3c9   : > { %v5058_v13 = vpop.eup %4075 }
 0x3ca   : > { %v1906_v9 = vmul.f32 1.442695, %v1894_v12  ;;  %v1920_v17 = vsel %vm1865_vm10, %v5058_v13, 0.0  ;;  %v5064_v24 = vpop.eup %4077  ;;  %v1593_v19 = vperm.slane %v1527_v10, %v4852_v36 }
 0x3cb   : > { %1921 = vadd.xlane.f32.xlu0 %v1920_v17  ;;  %v1935_v30 = vsel %vm1865_vm10, %v5064_v24, 0.0 }
 0x3cc   : > { %4079 = vpow2.f32 %v1906_v9 }
 0x3cd   : > { %4081 = vpow2.f32 %v1904_v25 }
 0x3cf   : > { %v1883_v20 = vpop.xlane.xlu1 %1882  ;;  %v1508_v17 = vpop.permute.xlu2 %1507 }
 0x3d0   : > { %v1895_v14 = vsub.f32 %v1862_v50, %v1883_v20  ;;  %v1534_v28 = vshrl.u32 %v1508_v17, 16 }
 0x3d1   : > { %v1510_v32 = vpop.permute.xlu0 %1509 }
 0x3d2   : > { %v5070_v33 = vpop.eup %4079  ;;  %v1908_v29 = vmul.f32 1.442695, %v1895_v14  ;;  %v1521_v35 = vpack.i.b16 %v1510_v32, %v1506_v53  ;;  %v1523_v37 = vshrl.u32 %v1510_v32, 16 }
 0x3d3   : > { %1936 = vadd.xlane.f32.xlu0 %v1935_v30  ;;  %v1926_v34 = vsel %vm1865_vm10, %v5070_v33, 0.0  ;;  %v5080_v11 = vpop.eup %4081 }
 0x3d4   : > { %4083 = vpow2.f32 %v1908_v29  ;;  %v1524_v26 = vpack.i.b16 %v1523_v37, %v1522_v15  ;;  %v1546_v23 = vperm.slane %v1521_v35, %v4852_v36  ;;  %1927 = vadd.xlane.f32.xlu1 %v1926_v34  ;;  %v1923_v57 = vsel %vm1865_vm10, %v5080_v11, 0.0 }
 0x3d5   : > { %4085 = vpow2.f32 %v1910_v45  ;;  %v1601_v15 = vrot.slane %v1593_v19, 4  ;;  %v1627_v29 = vrot.slane %v1619_v22, 4 }
 0x3d6   : > { %v1547_v41 = vrot.slane %v1546_v23, 4  ;;  %v1550_v42 = vsel %vm1059_vm7, %v1546_v23, %v1549_v40  ;;  %v1572_v43 = vperm.slane %v1524_v26, %v4852_v36 }
 0x3d7   : > { %v1558_v46 = vperm.slane %v1550_v42, %v4858_v49 }
 0x3d8   : > { %v1548_v47 = vsel %vm1059_vm7, %v1547_v41, %v1541_v16  ;;  %v1573_v48 = vrot.slane %v1572_v43, 4  ;;  %v1576_v50 = vsel %vm1059_vm7, %v1572_v43, %v1575_v27 }
 0x3d9   : > { %v1584_v51 = vperm.slane %v1576_v50, %v4858_v49  ;;  %v1554_v21 = vperm.slane %v1548_v47, %v4858_v49  ;;  %v1561_v54 = vrot.slane %v1558_v46, 4 }
 0x3da   : > { %v5085_v53 = vpop.eup %4083  ;;  %v1574_v55 = vsel %vm1059_vm7, %v1573_v48, %v1567_v31 }
 0x3db   : > { %v1580_v44 = vperm.slane %v1574_v55, %v4858_v49  ;;  %v1587_v39 = vrot.slane %v1584_v51, 4  ;;  %v1929_v58 = vsel %vm1865_vm10, %v5085_v53, 0.0  ;;  %v1559_v1 = vrot.slane %v1554_v21, 4  ;;  %v5097_v3 = vpop.eup %4085 }
 0x3dc   : > { %1924 = vadd.xlane.f32.xlu1 %v1923_v57  ;;  %1930 = vadd.xlane.f32.xlu2 %v1929_v58  ;;  %v1562_v2 = vsel %vm1059_vm7, 0, %v1561_v54  ;;  %v1932_v61 = vsel %vm1865_vm10, %v5097_v3, 0.0  ;;  %v1641_v35 = vsel %vm1059_vm7, %v1561_v54, %v1554_v21 }
 0x3dd   : > { %v1585_v59 = vrot.slane %v1580_v44, 4  ;;  %v1588_v62 = vsel %vm1059_vm7, 0, %v1587_v39  ;;  %v1646_v4 = vrot.slane %v1562_v2, 4  ;;  %v1560_v12 = vsel %vm1059_vm7, 0, %v1559_v1 }
 0x3de   : > { %v1665_v0 = vrot.slane %v1588_v62, 4  ;;  %v1660_v30 = vsel %vm1059_vm7, %v1587_v39, %v1580_v44  ;;  %v1645_v45 = vperm.slane %v1641_v35, %v4852_v36 }
 0x3df   : > { %v1586_v7 = vsel %vm1059_vm7, 0, %v1585_v59  ;;  %v1647_v18 = vsel %vm1059_vm7, %v1646_v4, %v1560_v12  ;;  %v1664_v27 = vperm.slane %v1660_v30, %v4852_v36 }
 0x3e0   : > { %v1666_v9 = vsel %vm1059_vm7, %v1665_v0, %v1586_v7  ;;  %v1651_v14 = vperm.slane %v1647_v18, %v4852_v36 }
 0x3e1   : > { %v1670_v20 = vperm.slane %v1666_v9, %v4852_v36 }
 0x3e2   : > { %v1652_v26 = vrot.slane %v1651_v14, 4 }
 0x3e3   : > { %v1671_v37 = vrot.slane %v1670_v20, 4 }
 0x3e4   : > { %1933 = vadd.xlane.f32.xlu2 %v1932_v61  ;;  %v1653_v21 = vsel %vm1059_vm7, %v1652_v26, %v1645_v45 }
 0x3e5   : > { %v1672_v50 = vsel %vm1059_vm7, %v1671_v37, %v1664_v27  ;;  %v1657_v0 = vperm.slane %v1653_v21, %v4858_v49 }
 0x3e6   : > { %v1676_v58 = vperm.slane %v1672_v50, %v4858_v49 }
 0x3e7   : > { %v1512_v25 = vpop.permute.xlu1 %1511  ;;  %v1658_v18 = vrot.slane %v1657_v0, 4  ;;  %v1720_v14 = vshrl.u32 %v1657_v0, 16 }
 0x3e8   : > { %v1533_v52 = vpack.i.b16 %v1512_v25, %v1508_v17  ;;  %v1535_v16 = vshrl.u32 %v1512_v25, 16  ;;  %v1677_v56 = vrot.slane %v1676_v58, 4  ;;  %v1721_v20 = vshrl.u32 %v1676_v58, 16 }
 0x3ea   : > { %v1536_v31 = vpack.i.b16 %v1535_v16, %v1534_v28  ;;  %v1598_v32 = vperm.slane %v1533_v52, %v4852_v36  ;;  %v1678_v52 = vsel %vm1059_vm7, 0, %v1677_v56 }
 0x3eb   : > { %v1727_v37 = vshrl.u32 %v1678_v52, 16 }
 0x3ec   : > { %v1599_v38 = vrot.slane %v1598_v32, 4  ;;  %v1602_v34 = vsel %vm1059_vm7, %v1598_v32, %v1601_v15  ;;  %v1624_v40 = vperm.slane %v1536_v31, %v4852_v36  ;;  %v1719_v31 = vpack.i.b16 %v1676_v58, %v1657_v0 }
 0x3ed   : > { %v1610_v23 = vperm.slane %v1602_v34, %v4858_v49  ;;  %v1659_v32 = vsel %vm1059_vm7, 0, %v1658_v18 }
 0x3ee   : > { %v1600_v41 = vsel %vm1059_vm7, %v1599_v38, %v1593_v19  ;;  %v1625_v42 = vrot.slane %v1624_v40, 4  ;;  %v1628_v43 = vsel %vm1059_vm7, %v1624_v40, %v1627_v29  ;;  %v1722_v29 = vpack.i.b16 %v1721_v20, %v1720_v14 }
 0x3ef   : > { %v1606_v46 = vperm.slane %v1600_v41, %v4858_v49  ;;  %v1613_v47 = vrot.slane %v1610_v23, 4  ;;  %v1636_v48 = vperm.slane %v1628_v43, %v4858_v49  ;;  %v1725_v23 = vpack.i.b16 %v1678_v52, %v1659_v32 }
 0x3f0   : > { %v1626_v51 = vsel %vm1059_vm7, %v1625_v42, %v1619_v22  ;;  %v1726_v27 = vshrl.u32 %v1659_v32, 16  ;;  %v1967_v41 = vunpack.c.l.b16 %v1719_v31  ;;  %v1993_v21 = vunpack.c.l.b16 %v1722_v29 }
 0x3f1   : > { %v1611_v54 = vrot.slane %v1606_v46, 4  ;;  %v1614_v55 = vsel %vm1059_vm7, 0, %v1613_v47  ;;  %v1632_v44 = vperm.slane %v1626_v51, %v4858_v49  ;;  %v1639_v39 = vrot.slane %v1636_v48, 4 }
 0x3f2   : > { %v1684_v57 = vrot.slane %v1614_v55, 4  ;;  %v1679_v2 = vsel %vm1059_vm7, %v1613_v47, %v1606_v46  ;;  %v1728_v47 = vpack.i.b16 %v1727_v37, %v1726_v27  ;;  %v2019_v55 = vunpack.c.l.b16 %v1725_v23 }
 0x3f3   : > { %v1612_v59 = vsel %vm1059_vm7, 0, %v1611_v54  ;;  %v1637_v62 = vrot.slane %v1632_v44, 4  ;;  %v1640_v1 = vsel %vm1059_vm7, 0, %v1639_v39  ;;  %v1698_v10 = vsel %vm1059_vm7, %v1639_v39, %v1632_v44 }
 0x3f4   : > { %v1703_v63 = vrot.slane %v1640_v1, 4  ;;  %v1685_v6 = vsel %vm1059_vm7, %v1684_v57, %v1612_v59  ;;  %v1683_v61 = vperm.slane %v1679_v2, %v4852_v36  ;;  %v1702_v22 = vperm.slane %v1698_v10, %v4852_v36 }
 0x3f5   : > { %v1638_v7 = vsel %vm1059_vm7, 0, %v1637_v62  ;;  %v1689_v4 = vperm.slane %v1685_v6, %v4852_v36  ;;  %v2045_v59 = vunpack.c.l.b16 %v1728_v47 }
 0x3f6   : > { %v1704_v12 = vsel %vm1059_vm7, %v1703_v63, %v1638_v7 }
 0x3f7   : > { %v1690_v9 = vrot.slane %v1689_v4, 4  ;;  %v1708_v17 = vperm.slane %v1704_v12, %v4852_v36 }
 0x3f9   : > { %v1691_v19 = vsel %vm1059_vm7, %v1690_v9, %v1683_v61  ;;  %v1709_v25 = vrot.slane %v1708_v17, 4 }
 0x3fa   : > { %v1695_v28 = vperm.slane %v1691_v19, %v4858_v49 }
 0x3fb   : > { %v1710_v16 = vsel %vm1059_vm7, %v1709_v25, %v1702_v22 }
 0x3fc   : > { %v1714_v15 = vperm.slane %v1710_v16, %v4858_v49  ;;  %v1696_v30 = vrot.slane %v1695_v28, 4  ;;  %v1732_v35 = vshrl.u32 %v1695_v28, 16 }
 0x3fe   : > { %v1731_v38 = vpack.i.b16 %v1714_v15, %v1695_v28  ;;  %v1733_v34 = vshrl.u32 %v1714_v15, 16  ;;  %v1697_v40 = vsel %vm1059_vm7, 0, %v1696_v30  ;;  %v1715_v26 = vrot.slane %v1714_v15, 4 }
 0x3ff   : > { %v1738_v48 = vshrl.u32 %v1697_v40, 16 }
 0x400   : > { %v1968_v42 = vunpack.c.l.b16 %v1731_v38  ;;  %v1734_v43 = vpack.i.b16 %v1733_v34, %v1732_v35  ;;  %v1716_v45 = vsel %vm1059_vm7, 0, %v1715_v26 }
 0x401   : > { %v1737_v46 = vpack.i.b16 %v1716_v45, %v1697_v40  ;;  %v1739_v50 = vshrl.u32 %v1716_v45, 16 }
 0x402   : > { %v1969_v51 = vpack.c.b16 %v1968_v42, %v1967_v41  ;;  %v1994_v54 = vunpack.c.l.b16 %v1734_v43 }
 0x403   : > { %v2020_v44 = vunpack.c.l.b16 %v1737_v46  ;;  %v1740_v39 = vpack.i.b16 %v1739_v50, %v1738_v48 }
 0x404   : > { %1981 = vmatpush.bf16.msrb.mxu2 %v1969_v51  ;;  %v1995_v57 = vpack.c.b16 %v1994_v54, %v1993_v21 }
 0x405   : > { %v2021_v58 = vpack.c.b16 %v2020_v44, %v2019_v55  ;;  %v2046_v62 = vunpack.c.l.b16 %v1740_v39 }
 0x407   : > { %2033 = vmatpush.bf16.msrb.mxu3 %v2021_v58  ;;  %v2047_v1 = vpack.c.b16 %v2046_v62, %v2045_v59 }
 0x408   : > { %2007 = vmatpush.bf16.msra.mxu2 %v1995_v57 }
 0x409   : > { %2059 = vmatpush.bf16.msra.mxu0 %v2047_v1 }
 0x42e   : > { %v1916_v2 = vpop.xlane.xlu2 %1915 }
 0x42f   : > { %4087 = vrcp.f32 %v1916_v2 }
 0x435   : > { %v4088_v0 = vpop.eup %4087 }
 0x436   : > { %v1919_v63 = vpop.xlane.xlu0 %1918  ;;  %v1946_v6 = vmul.f32 %v4088_v0, %v5050_v60 }
 0x437   : > { %4089 = vrcp.f32 %v1919_v63 }
 0x438   : > { %v1954_v4 = vpack.c.bf16 %v1946_v6, %v1946_v6 }
 0x43a   : > { %v1964_v56 = vunpack.c.l.b16 %v1954_v4 }
 0x43d   : > { %v4090_v7 = vpop.eup %4089 }
 0x43e   : > { %v1947_v10 = vmul.f32 %v4090_v7, %v5054_v5  ;;  %v1922_v17 = vpop.xlane.xlu0 %1921 }
 0x43f   : > { %4091 = vrcp.f32 %v1922_v17 }
 0x440   : > { %v1955_v12 = vpack.c.bf16 %v1947_v10, %v1947_v10 }
 0x442   : > { %v1965_v61 = vunpack.c.l.b16 %v1955_v12 }
 0x444   : > { %v1966_v9 = vpack.c.b16 %v1965_v61, %v1964_v56 }
 0x445   : > { %v4092_v22 = vpop.eup %4091 }
 0x446   : > { %3497 = vmatmul.msk.bf16.vlgmr.msrb.gmra.mxu2 %vm1865_vm10, %v1966_v9  ;;  %v1937_v25 = vpop.xlane.xlu0 %1936  ;;  %v1948_v28 = vmul.f32 %v4092_v22, %v5058_v13 }
 0x447   : > { %v1928_v18 = vpop.xlane.xlu1 %1927 }
 0x448   : > { %4093 = vrcp.f32 %v1928_v18  ;;  %v1956_v14 = vpack.c.bf16 %v1948_v28, %v1948_v28 }
 0x44a   : > { %v1990_v38 = vunpack.c.l.b16 %v1956_v14 }
 0x44e   : > { %v4094_v60 = vpop.eup %4093 }
 0x44f   : > { %v1925_v19 = vpop.xlane.xlu1 %1924  ;;  %v1931_v20 = vpop.xlane.xlu2 %1930  ;;  %v1950_v5 = vmul.f32 %v4094_v60, %v5070_v33 }
 0x450   : > { %4095 = vrcp.f32 %v1925_v19 }
 0x451   : > { %4097 = vrcp.f32 %v1931_v20  ;;  %v1958_v31 = vpack.c.bf16 %v1950_v5, %v1950_v5 }
 0x452   : > { %4099 = vrcp.f32 %v1937_v25 }
 0x453   : > { %v2016_v40 = vunpack.c.l.b16 %v1958_v31 }
 0x456   : > { %v4096_v52 = vpop.eup %4095 }
 0x457   : > { %v4098_v16 = vpop.eup %4097  ;;  %v1949_v15 = vmul.f32 %v4096_v52, %v5080_v11  ;;  %v1934_v30 = vpop.xlane.xlu2 %1933 }
 0x458   : > { %v1951_v32 = vmul.f32 %v4098_v16, %v5085_v53  ;;  %v4100_v29 = vpop.eup %4099  ;;  %4101 = vrcp.f32 %v1934_v30 }
 0x459   : > { %v1957_v35 = vpack.c.bf16 %v1949_v15, %v1949_v15  ;;  %v1953_v13 = vmul.f32 %v4100_v29, %v5064_v24 }
 0x45a   : > { %v1959_v37 = vpack.c.bf16 %v1951_v32, %v1951_v32 }
 0x45b   : > { %v1991_v34 = vunpack.c.l.b16 %v1957_v35  ;;  %v1961_v11 = vpack.c.bf16 %v1953_v13, %v1953_v13 }
 0x45c   : > { %v2017_v26 = vunpack.c.l.b16 %v1959_v37 }
 0x45d   : > { %v1992_v33 = vpack.c.b16 %v1991_v34, %v1990_v38  ;;  %v2043_v42 = vunpack.c.l.b16 %v1961_v11 }
 0x45e   : > { %v2018_v23 = vpack.c.b16 %v2017_v26, %v2016_v40  ;;  %v4102_v27 = vpop.eup %4101 }
 0x45f   : > { %3498 = vmatmul.msk.bf16.vlgmr.msra.gmra.mxu2 %vm1865_vm10, %v1992_v33  ;;  %v1952_v41 = vmul.f32 %v4102_v27, %v5097_v3 }
 0x460   : > { %3499 = vmatmul.msk.bf16.vlgmr.msrb.gmra.mxu3 %vm1865_vm10, %v2018_v23 }
 0x461   : > { %v1960_v53 = vpack.c.bf16 %v1952_v41, %v1952_v41 }
 0x463   : > { %v2042_v43 = vunpack.c.l.b16 %v1960_v53 }
 0x465   : > { %v2044_v45 = vpack.c.b16 %v2043_v42, %v2042_v43 }
 0x467   : > { %3500 = vmatmul.msk.bf16.vlgmr.msra.gmra.mxu0 %vm1865_vm10, %v2044_v45 }
 0x4c9   : > { %v1983_v46 = vpop.f32.mrf.mxu2 }
 0x4ca   : > { %v2069_v47 = vrot.slane %v1983_v46, 4 }
 0x4d1   : > { %v1985_v24 = vpop.f32.mrf.mxu2 }
 0x4d2   : > { %v2125_v10 = vrot.slane %v1985_v24, 4 }
 0x4e2   : > { %v2009_v48 = vpop.f32.mrf.mxu2 }
 0x4e3   : > { %v2081_v50 = vrot.slane %v2009_v48, 4  ;;  %v2035_v51 = vpop.f32.mrf.mxu3 }
 0x4e4   : > { %v2066_v21 = vrot.slane %v2035_v51, 4  ;;  %v2070_v54 = vsel %vm1059_vm7, %v2035_v51, %v2069_v47  ;;  %v2061_v3 = vpop.f32.mrf.mxu0 }
 0x4e5   : > { %v2078_v55 = vperm.slane %v2070_v54, %v4852_v36  ;;  %v2079_v39 = vrot.slane %v2061_v3, 4  ;;  %v2082_v57 = vsel %vm1059_vm7, %v2061_v3, %v2081_v50 }
 0x4e6   : > { %v2068_v44 = vsel %vm1059_vm7, %v2066_v21, %v1983_v46  ;;  %v2090_v62 = vperm.slane %v2082_v57, %v4852_v36 }
 0x4e7   : > { %v2074_v58 = vperm.slane %v2068_v44, %v4852_v36  ;;  %v2105_v59 = vrot.slane %v2078_v55, 4  ;;  %v2080_v1 = vsel %vm1059_vm7, %v2079_v39, %v2009_v48 }
 0x4e8   : > { %v2086_v63 = vperm.slane %v2080_v1, %v4852_v36  ;;  %v2103_v0 = vrot.slane %v2090_v62, 4 }
 0x4e9   : > { %v2093_v2 = vrot.slane %v2074_v58, 4  ;;  %v2106_v6 = vsel %vm1059_vm7, %v2090_v62, %v2105_v59 }
 0x4ea   : > { %v2114_v7 = vperm.slane %v2106_v6, %v4858_v49  ;;  %v2011_v4 = vpop.f32.mrf.mxu2  ;;  %v2091_v12 = vrot.slane %v2086_v63, 4  ;;  %v2104_v61 = vsel %vm1059_vm7, %v2103_v0, %v2078_v55 }
 0x4eb   : > { %v2094_v56 = vsel %vm1059_vm7, %v2086_v63, %v2093_v2  ;;  %v2037_v9 = vpop.f32.mrf.mxu3  ;;  %v2110_v18 = vperm.slane %v2104_v61, %v4858_v49  ;;  %v2137_v20 = vrot.slane %v2011_v4, 4 }
 0x4ec   : > { %v2102_v17 = vperm.slane %v2094_v56, %v4858_v49  ;;  %v2121_v19 = vrot.slane %v2114_v7, 4  ;;  %v2123_v22 = vrot.slane %v2037_v9, 4  ;;  %v2092_v25 = vsel %vm1059_vm7, %v2091_v12, %v2074_v58  ;;  %v2063_v30 = vpop.f32.mrf.mxu0 }
 0x4ed   : > { %v2126_v60 = vsel %vm1059_vm7, %v2037_v9, %v2125_v10  ;;  %v2098_v28 = vperm.slane %v2092_v25, %v4858_v49  ;;  %v2119_v52 = vrot.slane %v2110_v18, 4  ;;  %v2135_v27 = vrot.slane %v2063_v30, 4 }
 0x4ee   : > { %v2117_v5 = vrot.slane %v2102_v17, 4  ;;  %v2122_v16 = vsel %vm1059_vm7, 0.0, %v2121_v19  ;;  %v2190_v14 = vsel %vm1059_vm7, %v2121_v19, %v2110_v18  ;;  %v2124_v31 = vsel %vm1059_vm7, %v2123_v22, %v1985_v24 }
 0x4ef   : > { %v2195_v15 = vrot.slane %v2122_v16, 4  ;;  %v2134_v32 = vperm.slane %v2126_v60, %v4852_v36  ;;  %v2115_v29 = vrot.slane %v2098_v28, 4  ;;  %v2120_v37 = vsel %vm1059_vm7, 0.0, %v2119_v52 }
 0x4f0   : > { %v2118_v35 = vsel %vm1059_vm7, 0.0, %v2117_v5  ;;  %v2179_v38 = vsel %vm1059_vm7, %v2117_v5, %v2098_v28  ;;  %v2194_v13 = vperm.slane %v2190_v14, %v4852_v36  ;;  %v2130_v26 = vperm.slane %v2124_v31, %v4852_v36 }
 0x4f1   : > { %v2184_v34 = vrot.slane %v2118_v35, 4  ;;  %v2196_v40 = vsel %vm1059_vm7, %v2195_v15, %v2120_v37  ;;  %v2161_v23 = vrot.slane %v2134_v32, 4  ;;  %v2138_v11 = vsel %vm1059_vm7, %v2063_v30, %v2137_v20 }
 0x4f2   : > { %v2200_v33 = vperm.slane %v2196_v40, %v4852_v36  ;;  %v2215_v41 = vrot.slane %v2194_v13, 4  ;;  %v2149_v53 = vrot.slane %v2130_v26, 4  ;;  %v2146_v42 = vperm.slane %v2138_v11, %v4852_v36 }
 0x4f3   : > { %v2116_v43 = vsel %vm1059_vm7, 0.0, %v2115_v29  ;;  %v2136_v45 = vsel %vm1059_vm7, %v2135_v27, %v2011_v4  ;;  %v2183_v46 = vperm.slane %v2179_v38, %v4852_v36 }
 0x4f4   : > { %v2185_v24 = vsel %vm1059_vm7, %v2184_v34, %v2116_v43  ;;  %v2213_v47 = vrot.slane %v2200_v33, 4  ;;  %v2142_v48 = vperm.slane %v2136_v45, %v4852_v36  ;;  %v2159_v50 = vrot.slane %v2146_v42, 4 }
 0x4f5   : > { %v2162_v51 = vsel %vm1059_vm7, %v2146_v42, %v2161_v23  ;;  %v2189_v21 = vperm.slane %v2185_v24, %v4852_v36  ;;  %v2203_v39 = vrot.slane %v2183_v46, 4  ;;  %v2216_v62 = vsel %vm1059_vm7, %v2200_v33, %v2215_v41 }
 0x4f6   : > { %v2170_v54 = vperm.slane %v2162_v51, %v4858_v49  ;;  %v2147_v55 = vrot.slane %v2142_v48, 4  ;;  %v2150_v3 = vsel %vm1059_vm7, %v2142_v48, %v2149_v53  ;;  %v2160_v44 = vsel %vm1059_vm7, %v2159_v50, %v2134_v32 }
 0x4f7   : > { %v2158_v57 = vperm.slane %v2150_v3, %v4858_v49  ;;  %v2166_v58 = vperm.slane %v2160_v44, %v4858_v49  ;;  %v2201_v2 = vrot.slane %v2189_v21, 4  ;;  %v2214_v63 = vsel %vm1059_vm7, %v2213_v47, %v2194_v13 }
 0x4f8   : > { %v2177_v59 = vrot.slane %v2170_v54, 4  ;;  %v2148_v1 = vsel %vm1059_vm7, %v2147_v55, %v2130_v26  ;;  %v2204_v56 = vsel %vm1059_vm7, %v2189_v21, %v2203_v39  ;;  %v2224_v61 = vperm.slane %v2216_v62, %v4858_v49  ;;  %v3834_v39 = vld [vmem:[#allocation13 + $0x38] sm:$0xff] }
 0x4f9   : > { %v2154_v0 = vperm.slane %v2148_v1, %v4858_v49  ;;  %v2173_v6 = vrot.slane %v2158_v57, 4  ;;  %v2175_v7 = vrot.slane %v2166_v58, 4  ;;  %v2202_v52 = vsel %vm1059_vm7, %v2201_v2, %v2183_v46  ;;  %2388 = vmatpush.bf16.msrb.mxu1 %v3834_v39  ;;  %v3833_v57 = vld [vmem:[#allocation13 + $0x30] sm:$0xff]  ;;  %v3830_v62 = vld [vmem:[#allocation13 + $0x18] sm:$0xff]  ;;  %v3828_v2 = vld [vmem:[#allocation13 + $0x8] sm:$0xff] }
 0x4fa   : > { %v2178_v4 = vsel %vm1059_vm7, 0.0, %v2177_v59  ;;  %v2244_v10 = vsel %vm1059_vm7, %v2177_v59, %v2166_v58  ;;  %v2212_v14 = vperm.slane %v2204_v56, %v4858_v49  ;;  %v2208_v30 = vperm.slane %v2202_v52, %v4858_v49  ;;  %v3832_v58 = vld [vmem:[#allocation13 + $0x28] sm:$0xff]  ;;  %v3831_v59 = vld [vmem:[#allocation13 + $0x20] sm:$0xff]  ;;  %v3829_v1 = vld [vmem:[#allocation13 + $0x10] sm:$0xff] }
 0x4fb   : > { %v2249_v12 = vrot.slane %v2178_v4, 4  ;;  %v2171_v9 = vrot.slane %v2154_v0, 4  ;;  %v2174_v17 = vsel %vm1059_vm7, 0.0, %v2173_v6  ;;  %v2176_v18 = vsel %vm1059_vm7, 0.0, %v2175_v7  ;;  %v3641_v39 = vld [vmem:[#allocation14 + $0xd8] sm:$0xf0] }
 0x4fc   : > { %v2233_v19 = vsel %vm1059_vm7, %v2173_v6, %v2154_v0  ;;  %v2238_v22 = vrot.slane %v2174_v17, 4  ;;  %v2248_v25 = vperm.slane %v2244_v10, %v4852_v36  ;;  %v2220_v29 = vperm.slane %v2214_v63, %v4858_v49  ;;  %v3827_v63 = vld [vmem:[#allocation13] sm:$0xff] }
 0x4fd   : > { %v2250_v20 = vsel %vm1059_vm7, %v2249_v12, %v2176_v18  ;;  %v2237_v60 = vperm.slane %v2233_v19, %v4852_v36  ;;  %v2172_v5 = vsel %vm1059_vm7, 0.0, %v2171_v9  ;;  %v2229_v37 = vrot.slane %v2224_v61, 4  ;;  %2389 = vmatpush.bf16.msrb.mxu1 %v3833_v57 }
 0x4fe   : > { %v2254_v28 = vperm.slane %v2250_v20, %v4852_v36  ;;  %v2269_v16 = vrot.slane %v2248_v25, 4  ;;  %v2239_v15 = vsel %vm1059_vm7, %v2238_v22, %v2172_v5  ;;  %v2225_v40 = vrot.slane %v2220_v29, 4 }
 0x4ff   : > { %v2257_v31 = vrot.slane %v2237_v60, 4  ;;  %v2243_v32 = vperm.slane %v2239_v15, %v4852_v36  ;;  %v2231_v23 = vrot.slane %v2212_v14, 4  ;;  %v2227_v43 = vrot.slane %v2208_v30, 4 }
 0x500   : > { %v2267_v35 = vrot.slane %v2254_v28, 4  ;;  %v2270_v38 = vsel %vm1059_vm7, %v2254_v28, %v2269_v16  ;;  %v2226_v53 = vsel %vm1059_vm7, %v2225_v40, %v2208_v30  ;;  %v2230_v46 = vsel %vm1059_vm7, %v2229_v37, %v2212_v14  ;;  %v4061_v28 = vld [vmem:[%s5514_s10] ss:$0 sm:$0xff] }
 0x501   : > { %v2258_v34 = vsel %vm1059_vm7, %v2243_v32, %v2257_v31  ;;  %v2278_v13 = vperm.slane %v2270_v38, %v4858_v49  ;;  %v2255_v26 = vrot.slane %v2243_v32, 4  ;;  %v2232_v50 = vsel %vm1059_vm7, %v2224_v61, %v2231_v23  ;;  %2390 = vmatpush.bf16.msrb.mxu1 %v3832_v58  ;;  %v4139_v16 = vld [vmem:[%s4766_s23] sm:$0xff]  ;;  %v4140_v32 = vld [vmem:[%s4766_s23 + $0x8] sm:$0xff] }
 0x502   : > { %v2266_v33 = vperm.slane %v2258_v34, %v4858_v49  ;;  %v2268_v27 = vsel %vm1059_vm7, %v2267_v35, %v2248_v25  ;;  %v2228_v3 = vsel %vm1059_vm7, %v2220_v29, %v2227_v43  ;;  %v3865_v23 = vld [vmem:[#allocation14 + $0xec] sm:$0xf0]  ;;  %v3615_v58 = vld [vmem:[#allocation14 + $0xa0] sm:$0xf] }
 0x503   : > { %v2283_v36 = vrot.slane %v2278_v13, 4  ;;  %v2256_v11 = vsel %vm1059_vm7, %v2255_v26, %v2237_v60  ;;  %v2274_v41 = vperm.slane %v2268_v27, %v4858_v49  ;;  %v3863_v27 = vld [vmem:[#allocation14 + $0xe4] sm:$0xf] }
 0x504   : > { %v2285_v42 = vrot.slane %v2266_v33, 4  ;;  %v2262_v45 = vperm.slane %v2256_v11, %v4858_v49  ;;  %v3649_v11 = vld [vmem:[#allocation14 + $0xf0] sm:$0xf0] }
 0x505   : > { %v2284_v24 = vsel %vm1059_vm7, %v2283_v36, %v2266_v33  ;;  %v2279_v47 = vrot.slane %v2274_v41, 4  ;;  %2391 = vmatpush.bf16.msrb.mxu1 %v3831_v59  ;;  %v3647_v33 = vld [vmem:[#allocation14 + $0xe0] sm:$0xf]  ;;  %v3857_v59 = vld [vmem:[#allocation14 + $0xac] sm:$0xf0] }
 0x506   : > { %v4046_v48 = vpack.i.bf16 %v2284_v24, %v2230_v46  ;;  %v2286_v51 = vsel %vm1059_vm7, %v2278_v13, %v2285_v42  ;;  %v2281_v21 = vrot.slane %v2262_v45, 4  ;;  %v3648_v36 = vor.u32 %v3865_v23, %v3647_v33  ;;  %v3657_v46 = vld [vmem:[#allocation14 + $0xf8] sm:$0xf0]  ;;  %v3848_v33 = vld [vmem:[#allocation14 + $0x6c] sm:$0xf] }
 0x507   : > { %v4051_v54 = vpack.i.bf16 %v2286_v51, %v2232_v50  ;;  %v2280_v55 = vsel %vm1059_vm7, %v2279_v47, %v2262_v45  ;;  %v3652_v42 = vor.u32 %v3863_v27, %v3649_v11  ;;  %v3864_v45 = vld [vmem:[#allocation14 + $0xec] sm:$0xf]  ;;  %v3631_v47 = vld [vmem:[#allocation14 + $0xc0] sm:$0xf]  ;;  %v3859_v50 = vld [vmem:[#allocation14 + $0xc4] sm:$0xf] }
 0x508   : > { %4047 = vrot.lane.b32.xlu2 %v4046_v48, %s4510_s0  ;;  %v2282_v49 = vsel %vm1059_vm7, %v2274_v41, %v2281_v21  ;;  %v3655_v41 = vld [vmem:[#allocation14 + $0xe8] sm:$0xf]  ;;  %2659 = vmatpush.bf16.msrb.mxu2 %v3648_v36  ;;  %v3660_v24 = vor.u32 %v3864_v45, %v3657_v46  ;;  %v3861_v48 = vld [vmem:[#allocation14 + $0xcc] sm:$0xf0]  ;;  %v3633_v21 = vld [vmem:[#allocation14 + $0xd0] sm:$0xf0] }
 0x509   : > { %4052 = vrot.lane.b32.xlu0 %v4051_v54, %s4511_s8  ;;  %v4041_v44 = vpack.i.bf16 %v2282_v49, %v2228_v3  ;;  %2392 = vmatpush.bf16.msrb.mxu1 %v3830_v62  ;;  %v3632_v51 = vor.u32 %v3861_v48, %v3631_v47  ;;  %v3639_v54 = vld [vmem:[#allocation14 + $0xc8] sm:$0xf]  ;;  %v3636_v3 = vor.u32 %v3859_v50, %v3633_v21  ;;  %v3855_v62 = vld [vmem:[#allocation14 + $0xa4] sm:$0xf]  ;;  %v3593_v23 = vld [vmem:[#allocation14 + $0x78] sm:$0xf0] }
 0x50a   : > { %2673 = vmatpush.bf16.msra.mxu3 %v3652_v42  ;;  %v3567_v27 = vld [vmem:[#allocation14 + $0x40] sm:$0xf]  ;;  %v3596_v36 = vor.u32 %v3848_v33, %v3593_v23  ;;  %v3845_v11 = vld [vmem:[#allocation14 + $0x4c] sm:$0xf0]  ;;  %v3575_v46 = vld [vmem:[#allocation14 + $0x48] sm:$0xf] }
 0x50b   : > { %4042 = vrot.lane.b32.xlu1 %v4041_v44, %s4512_s29  ;;  %v3860_v44 = vld [vmem:[#allocation14 + $0xcc] sm:$0xf]  ;;  %v3577_v50 = vld [vmem:[#allocation14 + $0x58] sm:$0xf0]  ;;  %s5560_s0 = sld [smem:[#allocation33_spill]]  ;;  %s3899_s29 = sshll.u32 %s4631_s18, 4 }
 0x50c   : > { %2660 = vmatpush.bf16.msrb.mxu2 %v3632_v51  ;;  %v3644_v57 = vor.u32 %v3860_v44, %v3641_v39  ;;  %v3844_v48 = vld [vmem:[#allocation14 + $0x4c] sm:$0xf]  ;;  %v3551_v51 = vld [vmem:[#allocation14 + $0x20] sm:$0xf]  ;;  %v3559_v44 = vld [vmem:[#allocation14 + $0x28] sm:$0xf]  ;;  %s3219_s23 = scalar_lea.hbm %s5576_s15, %s3899_s29 }
 0x50d   : > { %2393 = vmatpush.bf16.msrb.mxu1 %v3829_v1  ;;  %v3616_v1 = vor.u32 %v3857_v59, %v3615_v58  ;;  %v3580_v21 = vor.u32 %v3844_v48, %v3577_v50  ;;  %v3842_v39 = vld [vmem:[#allocation14 + $0x34] sm:$0xf0]  ;;  %v4063_v23 = vld [vmem:[%s5559_s5] ss:$0 sm:$0xff]  ;;  %s3222_s5 = sshll.u32 %s3219_s23, 4  ;;  %s3208_s18 = scalar_lea.sflag [#allocation4], %s4760_s20  ;;  %s3223_s5 = int_to_ptr.hbm [resolvable:$true] %s3222_s5 }
 0x50e   : > { %2674 = vmatpush.bf16.msra.mxu3 %v3636_v3  ;;  %v3553_v3 = vld [vmem:[#allocation14 + $0x30] sm:$0xf0]  ;;  %v3560_v59 = vor.u32 %v3842_v39, %v3559_v44  ;;  %v3888_v44 = vld [vmem:[#allocation16 + $0xa8] sm:$0xff]  ;;  %s4425_s13 = sshra.s32 %s3223_s5, 4  ;;  %s4431_s8 = scalar_lea.hbm %s5576_s15, 32  ;;  %s4426_s13 = int_to_ptr.hbm [resolvable:$true] %s4425_s13 }
 0x50f   : > { %v3896_v39 = vld [vmem:[#allocation16 + $0xe8] sm:$0xff]  ;;  %s4427_s9 = scalar_lea.hbm %s4426_s13, 16  ;;  %p4432_p12 = scmp.lt.s32.totalorder %s4426_s13, %s5576_s15 }
 0x510   : > { %2661 = vmatpush.bf16.msrb.mxu2 %v3616_v1  ;;  %v3535_v1 = vld [vmem:[#allocation14] sm:$0xf]  ;;  %p4428_p1 = scmp.ne.s32.totalorder %s4426_s13, %s4427_s9  ;;  %p4433_p7 = scmp.lt.s32.totalorder %s4431_s8, %s4427_s9 }
 0x511   : > { %2394 = vmatpush.bf16.msrb.mxu1 %v3828_v2  ;;  %v3617_v2 = vld [vmem:[#allocation14 + $0xb0] sm:$0xf0] }
 0x512   : > { %p4429_p3 = pnand %p4428_p1, %p4729_p5  ;;  %p4434_p8 = por %p4433_p7, %p4432_p12 }
 0x514   : > { %p4430_p4 = pneg %p4429_p3 }
 0x515   : > { %2395 = vmatpush.bf16.msrb.mxu1 %v3827_v63  ;;  %v3623_v63 = vld [vmem:[#allocation14 + $0xa8] sm:$0xf] }
 0x516   : > { %p4435_p9 = pnand %p4434_p8, %p4430_p4 }
 0x519   : > { %2701 = vmatpush.bf16.msra.mxu1 %v3660_v24  ;;  %v3846_v24 = vld [vmem:[#allocation14 + $0x54] sm:$0xf0] }
 0x51a   : > { %v3576_v47 = vor.u32 %v3846_v24, %v3575_v46  ;;  %v3897_v46 = vld [vmem:[#allocation16 + $0xf0] sm:$0xff] }
 0x51d   : > { %2702 = vmatpush.bf16.msra.mxu1 %v3644_v57  ;;  %v3840_v57 = vld [vmem:[#allocation14 + $0x2c] sm:$0xf] }
 0x562   : > { %v4048_v0 = vpop.permute.xlu2 %4047 }
 0x563   : > { %v4050_v12 = vunpack.i.h.bf16 %v4048_v0  ;;  %v4049_v56 = vunpack.i.l.bf16 %v4048_v0  ;;  %v3858_v0 = vld [vmem:[#allocation14 + $0xb4] sm:$0xf0] }
 0x57b   : > { %v4053_v6 = vpop.permute.xlu0 %4052 }
 0x57c   : > { %v4055_v61 = vunpack.i.h.bf16 %v4053_v6  ;;  %v4054_v9 = vunpack.i.l.bf16 %v4053_v6  ;;  %v3620_v6 = vor.u32 %v3855_v62, %v3617_v2  ;;  %v3561_v62 = vld [vmem:[#allocation14 + $0x38] sm:$0xf0]  ;;  %v3837_v2 = vld [vmem:[#allocation14 + $0xc] sm:$0xf0] }
 0x57d   : > { %v4043_v7 = vpop.permute.xlu1 %4042 }
 0x57e   : > { %v4045_v4 = vunpack.i.h.bf16 %v4043_v7  ;;  %v4044_v10 = vunpack.i.l.bf16 %v4043_v7  ;;  %v3624_v7 = vor.u32 %v3858_v0, %v3623_v63  ;;  %2675 = vmatpush.bf16.msra.mxu3 %v3620_v6  ;;  %v3564_v0 = vor.u32 %v3840_v57, %v3561_v62  ;;  %v3835_v6 = vld [vmem:[#allocation14 + $0x4] sm:$0xf] }
 0x580   : > { %v2311_v17 = vsel %vm1747_vm8, %v2226_v53, %v4044_v10  ;;  %v2312_v18 = vsel %vm1747_vm8, %v2280_v55, %v4045_v4  ;;  %v3866_v53 = vld [vmem:[#allocation14 + $0xf4] sm:$0xf0]  ;;  %v3856_v4 = vld [vmem:[#allocation14 + $0xac] sm:$0xf]  ;;  %v3625_v10 = vld [vmem:[#allocation14 + $0xb8] sm:$0xf0] }
 0x581   : > { %v2314_v19 = vsel %vm2313_vm12, %v2311_v17, %v4049_v56  ;;  %v2315_v22 = vsel %vm2313_vm12, %v2312_v18, %v4050_v12  ;;  %v3656_v43 = vor.u32 %v3866_v53, %v3655_v41  ;;  %v3862_v55 = vld [vmem:[#allocation14 + $0xd4] sm:$0xf0]  ;;  %v3628_v12 = vor.u32 %v3856_v4, %v3625_v10  ;;  %v3599_v56 = vld [vmem:[#allocation14 + $0x80] sm:$0xf]  ;;  %v3601_v18 = vld [vmem:[#allocation14 + $0x90] sm:$0xf0] }
 0x582   : > { %v2317_v25 = vsel %vm2316_vm13, %v2314_v19, %v4054_v9  ;;  %v2318_v20 = vsel %vm2316_vm13, %v2315_v22, %v4055_v61  ;;  %v3640_v49 = vor.u32 %v3862_v55, %v3639_v54  ;;  %v3853_v61 = vld [vmem:[#allocation14 + $0x8c] sm:$0xf0]  ;;  %v3851_v9 = vld [vmem:[#allocation14 + $0x84] sm:$0xf]  ;;  %v3607_v19 = vld [vmem:[#allocation14 + $0x88] sm:$0xf] }
 0x583   : > { %v2319_v60 = vpack.c.bf16 %v2318_v20, %v2317_v25  ;;  %2687 = vmatpush.bf16.msrb.mxu0 %v3656_v43  ;;  %2703 = vmatpush.bf16.msra.mxu1 %v3628_v12  ;;  %v3600_v17 = vor.u32 %v3853_v61, %v3599_v56  ;;  %v3854_v22 = vld [vmem:[#allocation14 + $0x94] sm:$0xf0]  ;;  %v3604_v25 = vor.u32 %v3851_v9, %v3601_v18  ;;  %v3843_v41 = vld [vmem:[#allocation14 + $0x44] sm:$0xf]  ;;  %v3569_v53 = vld [vmem:[#allocation14 + $0x50] sm:$0xf0] }
 0x584   : > { %v3608_v20 = vor.u32 %v3854_v22, %v3607_v19  ;;  %v3568_v43 = vor.u32 %v3845_v11, %v3567_v27  ;;  %v3572_v45 = vor.u32 %v3843_v41, %v3569_v53  ;;  %v3841_v54 = vld [vmem:[#allocation14 + $0x2c] sm:$0xf0]  ;;  %v3839_v55 = vld [vmem:[#allocation14 + $0x24] sm:$0xf]  ;;  %v3543_v4 = vld [vmem:[#allocation14 + $0x8] sm:$0xf]  ;;  %v3536_v9 = vor.u32 %v3837_v2, %v3535_v1 }
 0x585   : > { %2396 = vmatmul.bf16.vlgmr.msrb.gmra.mxu1 %v2319_v60  ;;  %v3852_v60 = vld [vmem:[#allocation14 + $0x8c] sm:$0xf]  ;;  %2662 = vmatpush.bf16.msrb.mxu2 %v3600_v17  ;;  %v3556_v58 = vor.u32 %v3839_v55, %v3553_v3  ;;  %v3838_v12 = vld [vmem:[#allocation14 + $0x14] sm:$0xf0]  ;;  %v3545_v61 = vld [vmem:[#allocation14 + $0x18] sm:$0xf0] }
 0x586   : > { %2676 = vmatpush.bf16.msra.mxu3 %v3604_v25  ;;  %v3836_v56 = vld [vmem:[#allocation14 + $0xc] sm:$0xf]  ;;  %v3544_v22 = vor.u32 %v3838_v12, %v3543_v4  ;;  %v3890_v53 = vld [vmem:[#allocation16 + $0xb8] sm:$0xff]  ;;  %v3873_v1 = vld [vmem:[#allocation16 + $0x30] sm:$0xff] }
 0x587   : > { %2688 = vmatpush.bf16.msrb.mxu0 %v3640_v49  ;;  %v3552_v49 = vor.u32 %v3841_v54, %v3551_v51  ;;  %v3874_v51 = vld [vmem:[#allocation16 + $0x38] sm:$0xff]  ;;  %v3881_v2 = vld [vmem:[#allocation16 + $0x70] sm:$0xff] }
 0x58b   : > { %2689 = vmatpush.bf16.msrb.mxu0 %v3624_v7  ;;  %v3537_v7 = vld [vmem:[#allocation14 + $0x10] sm:$0xf0] }
 0x58c   : > { %v3540_v19 = vor.u32 %v3835_v6, %v3537_v7  ;;  %v3887_v6 = vld [vmem:[#allocation16 + $0xa0] sm:$0xff] }
 0x58d   : > { %v3895_v7 = vld [vmem:[#allocation16 + $0xe0] sm:$0xff] }
 0x58f   : > { %2690 = vmatpush.bf16.msrb.mxu0 %v3608_v20  ;;  %v3548_v20 = vor.u32 %v3836_v56, %v3545_v61 }
 0x602   : > { %v2397_v5 = vpop.f32.mrf.mxu1 }
 0x603   : > { %v2398_v52 = vadd.f32 %v4061_v28, %v2397_v5 }
 0x605   : > { %v5251_v14 = vadd.f32 %v4139_v16, %v2398_v52  ;;  %v3583_v52 = vld [vmem:[#allocation14 + $0x60] sm:$0xf]  ;;  %v3849_v16 = vld [vmem:[#allocation14 + $0x6c] sm:$0xf0] }
 0x607   : > { %2406 = vadd.xlane.f32.xlu1 %v5251_v14 }
 0x60a   : > { %v2399_v15 = vpop.f32.mrf.mxu1 }
 0x60b   : > { %v2400_v31 = vadd.f32 %v4061_v28, %v2399_v15  ;;  %v3609_v28 = vld [vmem:[#allocation14 + $0x98] sm:$0xf0]  ;;  %v3847_v15 = vld [vmem:[#allocation14 + $0x64] sm:$0xf] }
 0x60c   : > { %v3612_v5 = vor.u32 %v3852_v60, %v3609_v28 }
 0x60d   : > { %v5255_v30 = vadd.f32 %v4140_v32, %v2400_v31  ;;  %v3584_v32 = vor.u32 %v3849_v16, %v3583_v52 }
 0x60e   : > { %2704 = vmatpush.bf16.msra.mxu1 %v3612_v5 }
 0x60f   : > { %2408 = vadd.xlane.f32.xlu0 %v5255_v30  ;;  %2663 = vmatpush.bf16.msrb.mxu2 %v3584_v32 }
 0x612   : > { %2705 = vmatpush.bf16.msra.mxu1 %v3596_v36 }
 0x613   : > { %2664 = vmatpush.bf16.msrb.mxu2 %v3568_v43 }
 0x616   : > { %2706 = vmatpush.bf16.msra.mxu1 %v3580_v21  ;;  %v3882_v21 = vld [vmem:[#allocation16 + $0x78] sm:$0xff] }
 0x617   : > { %2665 = vmatpush.bf16.msrb.mxu2 %v3552_v49 }
 0x61a   : > { %2707 = vmatpush.bf16.msra.mxu1 %v3564_v0 }
 0x61b   : > { %2666 = vmatpush.bf16.msrb.mxu2 %v3536_v9 }
 0x61e   : > { %2708 = vmatpush.bf16.msra.mxu1 %v3548_v20 }
 0x61f   : > { %3147 = vmatpush.bf16.msra.mxu2 %v3874_v51 }
 0x623   : > { %3148 = vmatpush.bf16.msra.mxu2 %v3873_v1 }
 0x67a   : > { %v2407_v29 = vpop.xlane.xlu1 %2406 }
 0x67b   : > { %v2410_v35 = vmul.f32 %v2407_v29, %v4790_v8  ;;  %v3585_v29 = vld [vmem:[#allocation14 + $0x70] sm:$0xf0] }
 0x67d   : > { %v5260_v37 = vsub.f32 %v5251_v14, %v2410_v35  ;;  %v3591_v35 = vld [vmem:[#allocation14 + $0x68] sm:$0xf] }
 0x67f   : > { %v2414_v38 = vmul.f32 %v5260_v37, %v5260_v37 }
 0x681   : > { %2416 = vadd.xlane.f32.xlu2 %v2414_v38  ;;  %v3850_v38 = vld [vmem:[#allocation14 + $0x74] sm:$0xf0] }
 0x682   : > { %v2409_v34 = vpop.xlane.xlu0 %2408 }
 0x683   : > { %v2411_v13 = vmul.f32 %v2409_v34, %v4790_v8 }
 0x685   : > { %v5266_v40 = vsub.f32 %v5255_v30, %v2411_v13  ;;  %v3588_v13 = vor.u32 %v3847_v15, %v3585_v29 }
 0x687   : > { %v2415_v26 = vmul.f32 %v5266_v40, %v5266_v40  ;;  %2677 = vmatpush.bf16.msra.mxu3 %v3588_v13 }
 0x689   : > { %2418 = vadd.xlane.f32.xlu1 %v2415_v26  ;;  %v3592_v26 = vor.u32 %v3850_v38, %v3591_v35  ;;  %v4062_v38 = vld [vmem:[%s5515_s11] ss:$0 sm:$0xff] }
 0x68b   : > { %2691 = vmatpush.bf16.msrb.mxu0 %v3592_v26  ;;  %2678 = vmatpush.bf16.msra.mxu3 %v3572_v45  ;;  %v3889_v45 = vld [vmem:[#allocation16 + $0xb0] sm:$0xff] }
 0x68f   : > { %2692 = vmatpush.bf16.msrb.mxu0 %v3576_v47  ;;  %2679 = vmatpush.bf16.msra.mxu3 %v3556_v58 }
 0x693   : > { %2693 = vmatpush.bf16.msrb.mxu0 %v3560_v59  ;;  %2680 = vmatpush.bf16.msra.mxu3 %v3540_v19 }
 0x697   : > { %2694 = vmatpush.bf16.msrb.mxu0 %v3544_v22  ;;  %3161 = vmatpush.bf16.msrb.mxu3 %v3882_v21 }
 0x69b   : > { %3175 = vmatpush.bf16.msra.mxu0 %v3890_v53  ;;  %3162 = vmatpush.bf16.msrb.mxu3 %v3881_v2 }
 0x69f   : > { %3176 = vmatpush.bf16.msra.mxu0 %v3889_v45  ;;  %v3877_v45 = vld [vmem:[#allocation16 + $0x50] sm:$0xff] }
 0x6a3   : > { %3177 = vmatpush.bf16.msra.mxu0 %v3888_v44 }
 0x6a7   : > { %3178 = vmatpush.bf16.msra.mxu0 %v3887_v6 }
 0x6f4   : > { %v2417_v31 = vpop.xlane.xlu2 %2416 }
 0x6f5   : > { %v2420_v34 = vmul.f32 %v2417_v31, %v4790_v8 }
 0x6f7   : > { %v5271_v42 = vadd.f32 1e-05, %v2420_v34 }
 0x6f9   : > { %4103 = vrsqrt.f32 %v5271_v42  ;;  %vm2430_vm15 = vweird.f32 %v5271_v42 }
 0x6fc   : > { %v2419_v63 = vpop.xlane.xlu1 %2418 }
 0x6fd   : > { %v2421_v10 = vmul.f32 %v2419_v63, %v4790_v8 }
 0x6ff   : > { %v4104_v17 = vpop.eup %4103  ;;  %v2423_v18 = vadd.f32 1e-05, %v2421_v10 }
 0x700   : > { %v2425_v25 = vmul.f32 %v4104_v17, %v5271_v42  ;;  %vm2431_vm14 = vweird.f32 %v4104_v17 }
 0x701   : > { %4105 = vrsqrt.f32 %v2423_v18  ;;  %vm2432_vm0 = vmor %vm2430_vm15, %vm2431_vm14  ;;  %vm2440_vm2 = vweird.f32 %v2423_v18 }
 0x702   : > { %v2426_v60 = vmul.f32 %v4104_v17, %v2425_v25 }
 0x704   : > { %v2427_v8 = vmul.f32 0.5, %v2426_v60  ;;  %v3886_v60 = vld [vmem:[#allocation16 + $0x98] sm:$0xff] }
 0x705   : > { %3179 = vmatpush.bf16.msra.mxu0 %v3886_v60 }
 0x706   : > { %v2428_v28 = vsub.f32 1.5, %v2427_v8  ;;  %v3894_v8 = vld [vmem:[#allocation16 + $0xd8] sm:$0xff] }
 0x707   : > { %v4106_v5 = vpop.eup %4105 }
 0x708   : > { %v2429_v52 = vmul.f32 %v4104_v17, %v2428_v28  ;;  %v2435_v16 = vmul.f32 %v4106_v5, %v2423_v18  ;;  %vm2441_vm1 = vweird.f32 %v4106_v5  ;;  %v3880_v18 = vld [vmem:[#allocation16 + $0x68] sm:$0xff] }
 0x709   : > { %vm2442_vm3 = vmor %vm2440_vm2, %vm2441_vm1  ;;  %3163 = vmatpush.bf16.msrb.mxu3 %v3880_v18 }
 0x70a   : > { %v2436_v15 = vmul.f32 %v4106_v5, %v2435_v16  ;;  %v2433_v31 = vsel %vm2432_vm0, %v4104_v17, %v2429_v52  ;;  %v3872_v17 = vld [vmem:[#allocation16 + $0x28] sm:$0xff]  ;;  %v3871_v16 = vld [vmem:[#allocation16 + $0x20] sm:$0xff] }
 0x70b   : > { %v2444_v35 = vmul.f32 %v2433_v31, %v5260_v37  ;;  %v5288_v37 = vld [vmem:[%s5560_s0] sm:$0xf]  ;;  %3149 = vmatpush.bf16.msra.mxu2 %v3872_v17 }
 0x70c   : > { %v2437_v32 = vmul.f32 0.5, %v2436_v15  ;;  %v2493_v42 = vperm.slane %v5288_v37, 2  ;;  %v2494_v43 = vperm.slane %v5288_v37, 3  ;;  %v2491_v54 = vperm.slane %v5288_v37, 0  ;;  %v3879_v15 = vld [vmem:[#allocation16 + $0x60] sm:$0xff] }
 0x70d   : > { %v2449_v33 = vmul.f32 %v4062_v38, %v2444_v35  ;;  %v2492_v55 = vperm.slane %v5288_v37, 1  ;;  %3164 = vmatpush.bf16.msrb.mxu3 %v3879_v15 }
 0x70e   : > { %v2438_v29 = vsub.f32 1.5, %v2437_v32 }
 0x70f   : > { %v2454_v36 = vadd.f32 %v4063_v23, %v2449_v33  ;;  %3150 = vmatpush.bf16.msra.mxu2 %v3871_v16  ;;  %v3878_v33 = vld [vmem:[#allocation16 + $0x58] sm:$0xff] }
 0x710   : > { %v2439_v34 = vmul.f32 %v4106_v5, %v2438_v29 }
 0x711   : > { %3165 = vmatpush.bf16.msrb.mxu3 %v3878_v33 }
 0x712   : > { %v2443_v13 = vsel %vm2442_vm3, %v4106_v5, %v2439_v34  ;;  %v3885_v34 = vld [vmem:[#allocation16 + $0x90] sm:$0xff] }
 0x713   : > { %v2445_v26 = vmul.f32 %v2443_v13, %v5266_v40  ;;  %v3898_v40 = vld [vmem:[#allocation16 + $0xf8] sm:$0xff]  ;;  %v3893_v13 = vld [vmem:[#allocation16 + $0xd0] sm:$0xff]  ;;  %3180 = vmatpush.bf16.msra.mxu0 %v3885_v34 }
 0x714   : > { %3189 = vmatpush.bf16.msrb.mxu1 %v3898_v40  ;;  %v3892_v40 = vld [vmem:[#allocation16 + $0xc8] sm:$0xff] }
 0x715   : > { %v2450_v27 = vmul.f32 %v4062_v38, %v2445_v26  ;;  %v3870_v26 = vld [vmem:[#allocation16 + $0x18] sm:$0xff]  ;;  %3166 = vmatpush.bf16.msrb.mxu3 %v3877_v45 }
 0x716   : > { %3151 = vmatpush.bf16.msra.mxu2 %v3870_v26 }
 0x717   : > { %v2455_v11 = vadd.f32 %v4063_v23, %v2450_v27 }
 0x718   : > { %3190 = vmatpush.bf16.msrb.mxu1 %v3897_v46 }
 0x719   : > { %v2456_v41 = vpack.c.bf16 %v2455_v11, %v2454_v36  ;;  %v3884_v11 = vld [vmem:[#allocation16 + $0x88] sm:$0xff] }
 0x71a   : > { %3181 = vmatpush.bf16.msra.mxu0 %v3884_v11 }
 0x71b   : > { %2667 = vmatmul.bf16.vlgmr.msrb.gmra.mxu2 %v2456_v41  ;;  %2681 = vmatmul.bf16.vlgmr.msra.gmra.mxu3 %v2456_v41 }
 0x71c   : > { %2695 = vmatmul.bf16.vlgmr.msrb.gmra.mxu0 %v2456_v41  ;;  %2709 = vmatmul.bf16.vlgmr.msra.gmra.mxu1 %v2456_v41 }
 0x71d   : > { %3191 = vmatpush.bf16.msrb.mxu1 %v3896_v39 }
 0x721   : > { %3192 = vmatpush.bf16.msrb.mxu1 %v3895_v7 }
 0x725   : > { %3193 = vmatpush.bf16.msrb.mxu1 %v3894_v8 }
 0x729   : > { %3194 = vmatpush.bf16.msrb.mxu1 %v3893_v13 }
 0x72d   : > { %3195 = vmatpush.bf16.msrb.mxu1 %v3892_v40 }
 0x799   : > { %v2696_v24 = vpop.f32.mrf.mxu0  ;;  %v2710_v47 = vpop.f32.mrf.mxu1 }
 0x79a   : > { %v5292_v48 = vadd.f32 %v2696_v24, %v2493_v42  ;;  %v5294_v50 = vadd.f32 %v2710_v47, %v2494_v43 }
 0x79c   : > { %v3663_v3 = vmul.f32 -1.702, %v5292_v48  ;;  %v3664_v49 = vmul.f32 -1.702, %v5294_v50 }
 0x79e   : > { %v2735_v57 = vmul.f32 1.442695, %v3663_v3  ;;  %v2737_v58 = vmul.f32 1.442695, %v3664_v49  ;;  %v2668_v59 = vpop.f32.mrf.mxu2  ;;  %v2682_v62 = vpop.f32.mrf.mxu3  ;;  %v3891_v3 = vld [vmem:[#allocation16 + $0xc0] sm:$0xff] }
 0x79f   : > { %v5300_v63 = vadd.f32 %v2668_v59, %v2491_v54  ;;  %v5304_v0 = vadd.f32 %v2682_v62, %v2492_v55  ;;  %v3868_v59 = vld [vmem:[#allocation16 + $0x8] sm:$0xff]  ;;  %3196 = vmatpush.bf16.msrb.mxu1 %v3891_v3 }
 0x7a0   : > { %4107 = vpow2.f32 %v2735_v57  ;;  %v3876_v62 = vld [vmem:[#allocation16 + $0x48] sm:$0xff] }
 0x7a1   : > { %4109 = vpow2.f32 %v2737_v58  ;;  %v3661_v4 = vmul.f32 -1.702, %v5300_v63  ;;  %v3662_v10 = vmul.f32 -1.702, %v5304_v0  ;;  %v2698_v12 = vpop.f32.mrf.mxu0  ;;  %v2712_v56 = vpop.f32.mrf.mxu1  ;;  %3167 = vmatpush.bf16.msrb.mxu3 %v3876_v62 }
 0x7a2   : > { %v5308_v61 = vadd.f32 %v2698_v12, %v2493_v42  ;;  %v5310_v9 = vadd.f32 %v2712_v56, %v2494_v43  ;;  %v3869_v43 = vld [vmem:[#allocation16 + $0x10] sm:$0xff] }
 0x7a3   : > { %v2731_v19 = vmul.f32 1.442695, %v3661_v4  ;;  %v2733_v22 = vmul.f32 1.442695, %v3662_v10  ;;  %3152 = vmatpush.bf16.msra.mxu2 %v3869_v43  ;;  %v3867_v4 = vld [vmem:[#allocation16] sm:$0xff] }
 0x7a4   : > { %v3667_v25 = vmul.f32 -1.702, %v5308_v61  ;;  %v3668_v20 = vmul.f32 -1.702, %v5310_v9  ;;  %v3875_v10 = vld [vmem:[#allocation16 + $0x40] sm:$0xff] }
 0x7a5   : > { %4111 = vpow2.f32 %v2731_v19  ;;  %3168 = vmatpush.bf16.msrb.mxu3 %v3875_v10 }
 0x7a6   : > { %v4108_v28 = vpop.eup %4107  ;;  %v2743_v5 = vmul.f32 1.442695, %v3667_v25  ;;  %v2670_v52 = vpop.f32.mrf.mxu2  ;;  %4113 = vpow2.f32 %v2733_v22  ;;  %v2745_v29 = vmul.f32 1.442695, %v3668_v20 }
 0x7a7   : > { %v4110_v31 = vpop.eup %4109  ;;  %v5314_v32 = vadd.f32 1.0, %v4108_v28  ;;  %v5316_v35 = vadd.f32 %v2670_v52, %v2491_v54  ;;  %v2684_v53 = vpop.f32.mrf.mxu3  ;;  %v3883_v54 = vld [vmem:[#allocation16 + $0x80] sm:$0xff]  ;;  %3153 = vmatpush.bf16.msra.mxu2 %v3868_v59 }
 0x7a8   : > { %v5318_v38 = vadd.f32 1.0, %v4110_v31  ;;  %4115 = vpow2.f32 %v2743_v5  ;;  %v5334_v21 = vadd.f32 %v2684_v53, %v2492_v55  ;;  %3182 = vmatpush.bf16.msra.mxu0 %v3883_v54 }
 0x7a9   : > { %4117 = vrcp.f32 %v5314_v32  ;;  %v3665_v27 = vmul.f32 -1.702, %v5316_v35  ;;  %v2794_v7 = vand.u32 2147483647, %v5314_v32  ;;  %v2796_v12 = vand.u32 2147483648, %v5314_v32 }
 0x7aa   : > { %4119 = vrcp.f32 %v5318_v38  ;;  %v3666_v37 = vmul.f32 -1.702, %v5334_v21  ;;  %v2809_v56 = vand.u32 2147483647, %v5318_v38  ;;  %v2811_v17 = vand.u32 2147483648, %v5318_v38 }
 0x7ab   : > { %v4112_v23 = vpop.eup %4111  ;;  %4121 = vpow2.f32 %v2745_v29  ;;  %v2739_v24 = vmul.f32 1.442695, %v3665_v27  ;;  %3154 = vmatpush.bf16.msra.mxu2 %v3867_v4  ;;  %vm2790_vm5 = vweird.f32 %v5314_v32  ;;  %vm5361_vm6 = vcmp.eq.f32.partialorder %v2794_v7, 8.507059e+37 }
 0x7ac   : > { %v5323_v36 = vadd.f32 1.0, %v4112_v23  ;;  %v4114_v41 = vpop.eup %4113  ;;  %v2741_v18 = vmul.f32 1.442695, %v3666_v37  ;;  %vm2805_vm7 = vweird.f32 %v5318_v38  ;;  %v2797_v28 = vor.u32 1.1754944e-38, %v2796_v12 }
 0x7ad   : > { %v5338_v57 = vadd.f32 1.0, %v4114_v41  ;;  %vm5366_vm8 = vcmp.eq.f32.partialorder %v2809_v56, 8.507059e+37  ;;  %v2812_v52 = vor.u32 1.1754944e-38, %v2811_v17 }
 0x7ae   : > { %v4116_v42 = vpop.eup %4115  ;;  %4123 = vrcp.f32 %v5323_v36  ;;  %v2766_v27 = vand.u32 2147483648, %v5323_v36  ;;  %v2764_v56 = vand.u32 2147483647, %v5323_v36 }
 0x7af   : > { %v5325_v46 = vpop.eup %4117  ;;  %v5340_v58 = vadd.f32 1.0, %v4116_v42  ;;  %4125 = vpow2.f32 %v2739_v24 }
 0x7b0   : > { %v5327_v47 = vpop.eup %4119  ;;  %v2786_v51 = vmul.f32 %v5325_v46, %v5314_v32  ;;  %vm2791_vm4 = vweird.f32 %v5325_v46 }
 0x7b1   : > { %v4122_v49 = vpop.eup %4121  ;;  %v2801_v44 = vmul.f32 %v5327_v47, %v5318_v38  ;;  %4127 = vrcp.f32 %v5340_v58  ;;  %vm5373_vm9 = vmor %vm2790_vm5, %vm2791_vm4  ;;  %vm2806_vm10 = vweird.f32 %v5327_v47  ;;  %v2854_v32 = vand.u32 2147483647, %v5340_v58 }
 0x7b2   : > { %v2787_v39 = vsub.f32 1.0, %v2786_v51  ;;  %v5342_v1 = vadd.f32 1.0, %v4122_v49  ;;  %4129 = vrcp.f32 %v5338_v57  ;;  %vm2850_vm11 = vweird.f32 %v5340_v58  ;;  %vm5398_vm13 = vmor %vm2805_vm7, %vm2806_vm10 }
 0x7b3   : > { %v2802_v2 = vsub.f32 1.0, %v2801_v44  ;;  %v2856_v11 = vand.u32 2147483648, %v5340_v58  ;;  %vm5403_vm15 = vcmp.eq.f32.partialorder %v2854_v32, 8.507059e+37  ;;  %vm2760_vm4 = vweird.f32 %v5323_v36 }
 0x7b4   : > { %v2788_v55 = vmul.f32 %v5325_v46, %v2787_v39  ;;  %v5347_v6 = vpop.eup %4123  ;;  %4131 = vrcp.f32 %v5342_v1  ;;  %v2871_v38 = vand.u32 2147483648, %v5342_v1  ;;  %v2869_v39 = vand.u32 2147483647, %v5342_v1 }
 0x7b5   : > { %v4126_v19 = vpop.eup %4125  ;;  %v2803_v25 = vmul.f32 %v5327_v47, %v2802_v2  ;;  %v2756_v20 = vmul.f32 %v5347_v6, %v5323_v36  ;;  %4133 = vpow2.f32 %v2741_v18  ;;  %vm2761_vm14 = vweird.f32 %v5347_v6 }
 0x7b6   : > { %v2789_v22 = vadd.f32 %v5325_v46, %v2788_v55  ;;  %v5379_v29 = vadd.f32 1.0, %v4126_v19  ;;  %v2857_v49 = vor.u32 1.1754944e-38, %v2856_v11  ;;  %vm2865_vm2 = vweird.f32 %v5342_v1 }
 0x7b7   : > { %v4128_v60 = vpop.eup %4127  ;;  %v2804_v26 = vadd.f32 %v5327_v47, %v2803_v25  ;;  %v2757_v33 = vsub.f32 1.0, %v2756_v20  ;;  %v2872_v12 = vor.u32 1.1754944e-38, %v2871_v38  ;;  %vm2870_vm5 = vcmp.eq.f32.partialorder %v2869_v39, 8.507059e+37  ;;  %v4064_v38 = vld [vmem:[%s5575_s14] ss:$0 sm:$0xff] }
 0x7b8   : > { %v2846_v16 = vmul.f32 %v4128_v60, %v5340_v58  ;;  %v5371_v15 = vpop.eup %4129  ;;  %v2793_v13 = vsel %vm5373_vm9, %v5325_v46, %v2789_v22  ;;  %vm2851_vm12 = vweird.f32 %v4128_v60  ;;  %4135 = vrcp.f32 %v5379_v29 }
 0x7b9   : > { %v2771_v53 = vmul.f32 %v5371_v15, %v5338_v57  ;;  %v2798_v42 = vsel %vm5361_vm6, %v2797_v28, %v2793_v13  ;;  %v2808_v24 = vsel %vm5398_vm13, %v5327_v47, %v2804_v26  ;;  %v2758_v51 = vmul.f32 %v5347_v6, %v2757_v33  ;;  %vm2852_vm0 = vmor %vm2850_vm11, %vm2851_vm12 }
 0x7ba   : > { %v4132_v34 = vpop.eup %4131  ;;  %v2847_v23 = vsub.f32 1.0, %v2846_v16  ;;  %v2877_v47 = vmul.f32 %v2798_v42, %v5292_v48  ;;  %v2813_v55 = vsel %vm5366_vm8, %v2812_v52, %v2808_v24  ;;  %vm5433_vm6 = vmor %vm2760_vm4, %vm2761_vm14  ;;  %v2767_v36 = vor.u32 1.1754944e-38, %v2766_v27 }
 0x7bb   : > { %v2861_v41 = vmul.f32 %v4132_v34, %v5342_v1  ;;  %v4134_v3 = vpop.eup %4133  ;;  %vm2866_vm1 = vweird.f32 %v4132_v34  ;;  %v2772_v59 = vsub.f32 1.0, %v2771_v53  ;;  %v2759_v4 = vadd.f32 %v5347_v6, %v2758_v51 }
 0x7bc   : > { %v2848_v40 = vmul.f32 %v4128_v60, %v2847_v23  ;;  %v5416_v37 = vadd.f32 1.0, %v4134_v3  ;;  %vm2867_vm3 = vmor %vm2865_vm2, %vm2866_vm1  ;;  %v2878_v22 = vmul.f32 %v2813_v55, %v5294_v50  ;;  %v2826_v8 = vand.u32 2147483648, %v5379_v29 }
 0x7bd   : > { %v2862_v46 = vsub.f32 1.0, %v2861_v41  ;;  %v2773_v17 = vmul.f32 %v5371_v15, %v2772_v59  ;;  %v2824_v50 = vand.u32 2147483647, %v5379_v29  ;;  %vm2765_vm8 = vcmp.eq.f32.partialorder %v2764_v56, 8.507059e+37 }
 0x7be   : > { %v2849_v54 = vadd.f32 %v4128_v60, %v2848_v40  ;;  %v4136_v7 = vpop.eup %4135  ;;  %4137 = vrcp.f32 %v5416_v37  ;;  %vm2776_vm9 = vweird.f32 %v5371_v15  ;;  %vm2820_vm10 = vweird.f32 %v5379_v29 }
 0x7bf   : > { %v2863_v44 = vmul.f32 %v4132_v34, %v2862_v46  ;;  %v2816_v48 = vmul.f32 %v4136_v7, %v5379_v29  ;;  %vm2821_vm7 = vweird.f32 %v4136_v7  ;;  %v2774_v16 = vadd.f32 %v5371_v15, %v2773_v17 }
 0x7c0   : > { %v2853_v62 = vsel %vm2852_vm0, %v4128_v60, %v2849_v54  ;;  %v2763_v60 = vsel %vm5433_vm6, %v5347_v6, %v2759_v4  ;;  %vm2775_vm11 = vweird.f32 %v5338_v57  ;;  %v2781_v32 = vand.u32 2147483648, %v5338_v57  ;;  %vm2822_vm12 = vmor %vm2820_vm10, %vm2821_vm7 }
 0x7c1   : > { %v2858_v58 = vsel %vm5403_vm15, %v2857_v49, %v2853_v62  ;;  %v2864_v2 = vadd.f32 %v4132_v34, %v2863_v44  ;;  %v2817_v20 = vsub.f32 1.0, %v2816_v48  ;;  %vm5449_vm13 = vmor %vm2775_vm11, %vm2776_vm9  ;;  %v2779_v26 = vand.u32 2147483647, %v5338_v57 }
 0x7c2   : > { %v2881_v10 = vmul.f32 %v2858_v58, %v5308_v61  ;;  %vm2825_vm14 = vcmp.eq.f32.partialorder %v2824_v50, 8.507059e+37  ;;  %v2778_v27 = vsel %vm5449_vm13, %v5371_v15, %v2774_v16  ;;  %v2841_v41 = vand.u32 2147483648, %v5416_v37 }
 0x7c3   : > { %v2868_v1 = vsel %vm2867_vm3, %v4132_v34, %v2864_v2  ;;  %v2818_v5 = vmul.f32 %v4136_v7, %v2817_v20  ;;  %v2827_v34 = vor.u32 1.1754944e-38, %v2826_v8  ;;  %v2839_v42 = vand.u32 2147483647, %v5416_v37 }
 0x7c4   : > { %v2885_v18 = vpack.c.bf16 %v2881_v10, %v2877_v47  ;;  %v2873_v19 = vsel %vm2870_vm5, %v2872_v12, %v2868_v1  ;;  %v4138_v52 = vpop.eup %4137  ;;  %v2782_v43 = vor.u32 1.1754944e-38, %v2781_v32  ;;  %vm2780_vm0 = vcmp.eq.f32.partialorder %v2779_v26, 8.507059e+37 }
 0x7c5   : > { %v2882_v25 = vmul.f32 %v2873_v19, %v5310_v9  ;;  %v2768_v9 = vsel %vm2765_vm8, %v2767_v36, %v2763_v60  ;;  %v2819_v31 = vadd.f32 %v4136_v7, %v2818_v5  ;;  %v2831_v6 = vmul.f32 %v4138_v52, %v5416_v37 }
 0x7c6   : > { %3183 = vmatmul.bf16.vlgmr.msra.gmra.mxu0 %v2885_v18  ;;  %v2875_v29 = vmul.f32 %v2768_v9, %v5300_v63  ;;  %vm2836_vm15 = vweird.f32 %v4138_v52  ;;  %vm2835_vm1 = vweird.f32 %v5416_v37  ;;  %v2783_v63 = vsel %vm2780_vm0, %v2782_v43, %v2778_v27 }
 0x7c7   : > { %v2886_v28 = vpack.c.bf16 %v2882_v25, %v2878_v22  ;;  %v2823_v33 = vsel %vm2822_vm12, %v4136_v7, %v2819_v31  ;;  %v2832_v23 = vsub.f32 1.0, %v2831_v6  ;;  %vm2837_vm2 = vmor %vm2835_vm1, %vm2836_vm15  ;;  %v2842_v46 = vor.u32 1.1754944e-38, %v2841_v41 }
 0x7c8   : > { %v2828_v11 = vsel %vm2825_vm14, %v2827_v34, %v2823_v33  ;;  %vm2840_vm3 = vcmp.eq.f32.partialorder %v2839_v42, 8.507059e+37 }
 0x7c9   : > { %3197 = vmatmul.bf16.vlgmr.msrb.gmra.mxu1 %v2886_v28  ;;  %v2879_v53 = vmul.f32 %v2828_v11, %v5316_v35  ;;  %v2833_v40 = vmul.f32 %v4138_v52, %v2832_v23  ;;  %v2876_v35 = vmul.f32 %v2783_v63, %v5304_v0 }
 0x7cb   : > { %v2883_v57 = vpack.c.bf16 %v2879_v53, %v2875_v29  ;;  %v2834_v45 = vadd.f32 %v4138_v52, %v2833_v40 }
 0x7cd   : > { %v2838_v24 = vsel %vm2837_vm2, %v4138_v52, %v2834_v45  ;;  %3155 = vmatmul.bf16.vlgmr.msra.gmra.mxu2 %v2883_v57 }
 0x7ce   : > { %v2843_v15 = vsel %vm2840_vm3, %v2842_v46, %v2838_v24 }
 0x7cf   : > { %v2880_v51 = vmul.f32 %v2843_v15, %v5334_v21 }
 0x7d1   : > { %v2884_v54 = vpack.c.bf16 %v2880_v51, %v2876_v35 }
 0x7d3   : > { %3169 = vmatmul.bf16.vlgmr.msrb.gmra.mxu3 %v2884_v54 }
 0x843   : > { %v3184_v44 = vpop.f32.mrf.mxu0 }
 0x846   : > { %v3198_v62 = vpop.f32.mrf.mxu1 }
 0x84b   : > { %v3186_v7 = vpop.f32.mrf.mxu0 }
 0x84e   : > { %v3200_v10 = vpop.f32.mrf.mxu1 }
 0x850   : > { %v3156_v3 = vpop.f32.mrf.mxu2 }
 0x851   : > { %v3157_v49 = vadd.f32 %v4064_v38, %v3156_v3 }
 0x856   : > { %v3170_v39 = vpop.f32.mrf.mxu3 }
 0x857   : > { %v3171_v59 = vadd.f32 %v3170_v39, %v3157_v49 }
 0x858   : > { %v3158_v37 = vpop.f32.mrf.mxu2 }
 0x859   : > { %v3185_v47 = vadd.f32 %v3184_v44, %v3171_v59  ;;  %v3159_v58 = vadd.f32 %v4064_v38, %v3158_v37 }
 0x85b   : > { %v3199_v55 = vadd.f32 %v3198_v62, %v3185_v47 }
 0x85d   : > { %v3203_v0 = vadd.f32 %v3199_v55, %v5251_v14 }
 0x85e   : > { %v3172_v21 = vpop.f32.mrf.mxu3 }
 0x85f   : > { %3205 = vst [vmem:[%s696_s28] sm:$0xff] %v3203_v0  ;;  %v3173_v2 = vadd.f32 %v3172_v21, %v3159_v58 }
 0x861   : > { %v3187_v4 = vadd.f32 %v3186_v7, %v3173_v2 }
 0x863   : > { %v3201_v12 = vadd.f32 %v3200_v10, %v3187_v4 }
 0x865   : > { %v3204_v14 = vadd.f32 %v3201_v12, %v5255_v30 }
 0x867   : > { %3206 = vst [vmem:[%s696_s28 + $0x8] sm:$0xff] %v3204_v14 }
 0x868   : > { %4438 = shalt.err (!%p4435_p9)
}
 0x869   : > { %s4515_s20 = smov 128   ;;  %s4516_s29 = smov 8  }
 0x86a   : > { %3934 = dma.vmem_to_hbm [thread:$0]  (%p4729_p5), %s3221_s3, 256, %s3223_s5, %s3208_s18, %s4515_s20, %s4515_s20, %s4516_s29  }
 0x86b PF: > { %s3237_s28 = sand.u32 1, %s4481_s24   ;;  %p5577_p10 = scmp.ge.s32.totalorder %s4493_s27, 2 }
 0x86c   : > { %s3238_s17 = scalar_lea.sflag [#allocation4], %s3237_s28 }
 0x86d   : > { %p3966_p13 = pnand %p5577_p10, %p4733_p6 }
 0x86f   : > { %p3967_p11 = pneg %p3966_p13 }
 0x871   : > { %4476 = dma.done.wait (%p3967_p11), %s3238_s17, 256  }
 0x872   : > { %4478 = vsyncadd (%p3967_p11), %s3238_s17, 4294967040  ;;  %p34_p0 = scmp.ge.s32.totalorder %s4703_s12, 4   ;;  %s5578_s24 = smov %s4485_s25 }
 0x873   : > { %s5579_s25 = smov %s4489_s26  ;;  %s5580_s26 = smov %s4714_s16 }
 0x874   : > { %s5581_s27 = smov %s4703_s12  ;;  %36 = sbr.rel (!%p34_p0) target bundleno = 23 (0x17), region = 165 }
 0x879   :  { %3244 = vsyncpa [#allocation3], 1 }
 0x87a   :  { %3246 = vsyncpa [#allocation3 + $0x1], 1 }
 0x87b   :  { %3247 = vsyncpa [#allocation6], 1 }
 0x87c   :  { %3248 = vsyncpa [#allocation9], 1 }
 0x87d   :  { %3249 = vsyncpa [#allocation12], 1 }
 0x87e   :  { %3250 = vsyncpa [#allocation15], 1 }
 0x87f   :  { %3251 = vsyncpa [#allocation4], 1 }
 0x880   :  { %3253 = vsyncpa [#allocation4 + $0x1], 1 }

</bundles_post_ra>
